<compile_context>
chip_gen: v7x
topology: tpu7x:2x2x1
jax: 0.10.0
libtpu: 0.0.40
codegen_flags: <defaults>
</compile_context>

<pallas_src>
import jax
import jax.numpy as jnp
from jax import lax
from jax.experimental import pallas as pl
from jax.experimental.pallas import tpu as pltpu


LEAKY_SLOPE = 0.01
IN_EPS = 1e-5
C_PAD = 128  # lane-dense padded channel width (conv input and output)


def _decoder_block_kernel(x1_ref, x2_ref, w_ref, b_ref, o_ref, xpad_ref):
    """One batch element: fused upsample+concat+pad -> Conv3x3 -> InstanceNorm -> LeakyReLU.

    x1_ref  : (1, H//2, W//2, C1)  low-res features (NHWC, f32)
    x2_ref  : (1, H, W, C2)        skip connection  (NHWC, f32)
    w_ref   : (9, 128, 128)        conv taps, bf16, tap index = kh*3 + kw,
                                   rows [0:Cin) / cols [0:Cout) hold real weights
    b_ref   : (1, 128)             conv bias, f32, zero-padded
    o_ref   : (1, H*W, 128)        lane-dense output slab, f32
    xpad_ref: VMEM scratch (H+2, W+2, 128), f32 — padded, concatenated input
    """
    H, W, C2 = x2_ref.shape[1], x2_ref.shape[2], x2_ref.shape[3]
    w_half, C1 = x1_ref.shape[2], x1_ref.shape[3]
    Cp = w_ref.shape[2]

    # ---- fused data-movement glue (was repeat/concat/pad passes in HBM) -------
    # Zeroing gives both the 1-pixel spatial halo and zero channels [Cin:128).
    xpad_ref[...] = jnp.zeros_like(xpad_ref)

    # torch.cat([x2, x1_up], dim=1): skip connection -> channels [0:C2)
    xpad_ref[1:H + 1, 1:W + 1, 0:C2] = x2_ref[0]

    # nn.Upsample(scale_factor=2, mode="nearest") of x1 -> channels [C2:C2+C1)
    # Row duplication via leading-axis repeat (layout-safe); column duplication
    # via per-column broadcast stores (static unroll, W//2 small masked stores).
    x1_rows = jnp.repeat(x1_ref[0], 2, axis=0)              # (H, W//2, C1)
    for j in range(w_half):
        col = x1_rows[:, j:j + 1, :]                        # (H, 1, C1)
        xpad_ref[1:H + 1, 1 + 2 * j:3 + 2 * j, C2:C2 + C1] = (
            jnp.broadcast_to(col, (H, 2, C1)))

    # ---- 3x3 conv as 9 lane-dense MXU matmuls: (H*W,128) @ (128,128) ----------
    # bf16 operands, f32 accumulation.
    acc = jnp.zeros((H * W, Cp), dtype=jnp.float32)
    for kw in range(3):
        # One sublane-offset slice per kw; the kh slices below are on the
        # untiled leading axis (free) and the reshape is a layout no-op.
        xw = xpad_ref[:, kw:kw + W, :].astype(jnp.bfloat16)  # (H+2, W, 128)
        for kh in range(3):
            patch = xw[kh:kh + H].reshape(H * W, Cp)
            acc = acc + jnp.dot(patch, w_ref[kh * 3 + kw],
                                preferred_element_type=jnp.float32)
    acc = acc + b_ref[...]

    # ---- InstanceNorm2d (affine=False, biased variance) + LeakyReLU, all f32 --
    mean = jnp.mean(acc, axis=0, keepdims=True)
    var = jnp.mean((acc - mean) ** 2, axis=0, keepdims=True)
    y = (acc - mean) * lax.rsqrt(var + IN_EPS)
    y = jnp.where(y > 0, y, LEAKY_SLOPE * y)

    o_ref[0] = y.astype(o_ref.dtype)                         # unmasked, lane-dense


def decoder_block_forward(x1, x2, w, b):
    """DecoderBlock.forward.

    x1: (B, C1, H/2, W/2)  low-res features (NCHW)
    x2: (B, C2, H, W)      skip connection (NCHW)
    w : (Cout, Cin, 3, 3)  Conv2d weight, Cin = C1 + C2
    b : (Cout,)            Conv2d bias
    returns (B, Cout, H, W) NCHW, float32
    """
    B, C1, h_half, w_half = x1.shape
    _, C2, H, W = x2.shape
    Cout, Cin = w.shape[0], w.shape[1]
    assert Cin == C1 + C2 and H == 2 * h_half and W == 2 * w_half
    assert Cin <= C_PAD and Cout <= C_PAD
    assert W % 8 == 0  # keeps the in-kernel (H,W,128)->(H*W,128) reshape a free retag

    # Remaining wrapper glue: NCHW -> NHWC transposes only. Upsample, concat,
    # spatial pad and channel pad are fused into the kernel.
    x1_nhwc = jnp.transpose(x1, (0, 2, 3, 1)).astype(jnp.float32)
    x2_nhwc = jnp.transpose(x2, (0, 2, 3, 1)).astype(jnp.float32)

    # (Cout, Cin, 3, 3) -> (9, 128, 128) zero-padded bf16 taps, tap index kh*3+kw.
    w_taps = jnp.transpose(w, (2, 3, 1, 0)).reshape(9, Cin, Cout).astype(jnp.float32)
    w_pad = jnp.zeros((9, C_PAD, C_PAD), jnp.float32).at[:, :Cin, :Cout].set(w_taps)
    w_pad = w_pad.astype(jnp.bfloat16)
    b_pad = jnp.zeros((1, C_PAD), jnp.float32).at[0, :Cout].set(b.astype(jnp.float32))

    bytes_accessed = ((x1_nhwc.size + x2_nhwc.size) * 4 + w_pad.size * 2
                      + b_pad.size * 4 + B * H * W * C_PAD * 4)

    out_p = pl.pallas_call(
        _decoder_block_kernel,
        out_shape=jax.ShapeDtypeStruct((B, H * W, C_PAD), jnp.float32),
        grid_spec=pltpu.PrefetchScalarGridSpec(
            num_scalar_prefetch=0,
            grid=(B,),
            in_specs=[
                pl.BlockSpec((1, h_half, w_half, C1), lambda bi: (bi, 0, 0, 0)),
                pl.BlockSpec((1, H, W, C2), lambda bi: (bi, 0, 0, 0)),
                # grid-invariant residents: constant index_map, no per-step re-DMA
                pl.BlockSpec((9, C_PAD, C_PAD), lambda bi: (0, 0, 0)),
                pl.BlockSpec((1, C_PAD), lambda bi: (0, 0)),
            ],
            out_specs=pl.BlockSpec((1, H * W, C_PAD), lambda bi: (bi, 0, 0)),
            scratch_shapes=[pltpu.VMEM((H + 2, W + 2, C_PAD), jnp.float32)],
        ),
        compiler_params=pltpu.CompilerParams(
            dimension_semantics=("parallel",),
        ),
        cost_estimate=pl.CostEstimate(
            flops=2 * B * H * W * 9 * C_PAD * C_PAD,
            transcendentals=B * C_PAD,
            bytes_accessed=bytes_accessed,
        ),
    )(x1_nhwc, x2_nhwc, w_pad, b_pad)

    # Lane-dense slab -> (B, Cout, H, W)
    out = out_p[:, :, :Cout].reshape(B, H, W, Cout)
    return jnp.transpose(out, (0, 3, 1, 2))


def decoder_block_reference(x1, x2, w, b):
    """Pure-JAX f32 reference matching the PyTorch module semantics."""
    x1_up = jnp.repeat(jnp.repeat(x1, 2, axis=2), 2, axis=3)
    x = jnp.concatenate([x2, x1_up], axis=1)
    y = lax.conv_general_dilated(
        x.astype(jnp.float32),
        w.astype(jnp.float32),
        window_strides=(1, 1),
        padding="SAME",
        dimension_numbers=("NCHW", "OIHW", "NCHW"),
    ) + b[None, :, None, None]
    mean = jnp.mean(y, axis=(2, 3), keepdims=True)
    var = jnp.mean((y - mean) ** 2, axis=(2, 3), keepdims=True)
    y = (y - mean) / jnp.sqrt(var + IN_EPS)
    return jnp.where(y > 0, y, LEAKY_SLOPE * y)


if __name__ == "__main__":
    key = jax.random.PRNGKey(0)
    k1, k2, kw, kb = jax.random.split(key, 4)

    B = 2
    C1 = 4          # x1 channels (to be upsampled)
    C2 = 4          # skip-connection channels
    H = W = 16      # output spatial size
    Cin = C1 + C2   # conv in_channels after concat
    Cout = 4        # conv out_channels

    x1 = jax.random.normal(k1, (B, C1, H // 2, W // 2), dtype=jnp.float32)
    x2 = jax.random.normal(k2, (B, C2, H, W), dtype=jnp.float32)
    # Deterministic synthetic Conv2d parameters (no checkpoint load).
    w = jax.random.normal(kw, (Cout, Cin, 3, 3), dtype=jnp.float32) * 0.1
    b = jax.random.normal(kb, (Cout,), dtype=jnp.float32) * 0.1

    out = jax.block_until_ready(decoder_block_forward(x1, x2, w, b))
    ref = decoder_block_reference(x1, x2, w, b)

    assert out.shape == (B, Cout, H, W), out.shape
    # bf16 matmul operands (per perf review) with f32 accumulation/epilogue:
    # tolerance loosened from 1e-4 accordingly.
    assert jnp.allclose(out, ref, atol=5e-2, rtol=5e-2), float(jnp.max(jnp.abs(out - ref)))

    print("KERNEL_OK")
</pallas_src>

<mosaic_0001>
module attributes {stable_mosaic.version = 11 : i64} {
  func.func @_decoder_block_kernel(%arg0: i32, %arg1: memref<1x8x8x4xf32, #tpu.memory_space<vmem>>, %arg2: memref<1x16x16x4xf32, #tpu.memory_space<vmem>>, %arg3: memref<9x128x128xbf16, #tpu.memory_space<vmem>>, %arg4: memref<1x128xf32, #tpu.memory_space<vmem>>, %arg5: memref<1x256x128xf32, #tpu.memory_space<vmem>>, %arg6: memref<18x18x128xf32, #tpu.memory_space<vmem>>) attributes {dimension_semantics = [#tpu.dimension_semantics<parallel>], iteration_bounds = array<i64: 2>, scalar_prefetch = 0 : i64, scratch_operands = 1 : i64, tpu.core_type = #tpu.core_type<tc>, window_params = [{transform_indices = @transform_0, window_bounds = array<i64: 1, 8, 8, 4>}, {transform_indices = @transform_1, window_bounds = array<i64: 1, 16, 16, 4>}, {pipeline_mode = #tpu.pipeline_mode<synchronous>, transform_indices = @transform_2, window_bounds = array<i64: 9, 128, 128>}, {pipeline_mode = #tpu.pipeline_mode<synchronous>, transform_indices = @transform_3, window_bounds = array<i64: 1, 128>}, {transform_indices = @transform_4, window_bounds = array<i64: 1, 256, 128>}]} {
    %cst = arith.constant 0.000000e+00 : f32
    %0 = vector.broadcast %cst : f32 to vector<18x18x128xf32>
    %c0 = arith.constant 0 : index
    %c0_0 = arith.constant 0 : index
    %c0_1 = arith.constant 0 : index
    %1 = vector.load %arg6[%c0, %c0_0, %c0_1] : memref<18x18x128xf32, #tpu.memory_space<vmem>>, vector<18x18x128xf32>
    tpu.vector_store %arg6[%c0, %c0_0, %c0_1], %0 {strides = array<i32>} : memref<18x18x128xf32, #tpu.memory_space<vmem>>, vector<18x18x128xf32>,
    %c0_2 = arith.constant 0 : index
    %c0_3 = arith.constant 0 : index
    %c0_4 = arith.constant 0 : index
    %c0_5 = arith.constant 0 : index
    %2 = vector.load %arg2[%c0_2, %c0_3, %c0_4, %c0_5] : memref<1x16x16x4xf32, #tpu.memory_space<vmem>>, vector<1x16x16x4xf32>
    %3 = vector.shape_cast %2 : vector<1x16x16x4xf32> to vector<16x16x4xf32>
    %c1 = arith.constant 1 : index
    %c1_6 = arith.constant 1 : index
    %c0_7 = arith.constant 0 : index
    %4 = vector.load %arg6[%c1, %c1_6, %c0_7] : memref<18x18x128xf32, #tpu.memory_space<vmem>>, vector<16x16x4xf32>
    tpu.vector_store %arg6[%c1, %c1_6, %c0_7], %3 {strides = array<i32>} : memref<18x18x128xf32, #tpu.memory_space<vmem>>, vector<16x16x4xf32>,
    %c0_8 = arith.constant 0 : index
    %c0_9 = arith.constant 0 : index
    %c0_10 = arith.constant 0 : index
    %c0_11 = arith.constant 0 : index
    %5 = vector.load %arg1[%c0_8, %c0_9, %c0_10, %c0_11] : memref<1x8x8x4xf32, #tpu.memory_space<vmem>>, vector<1x8x8x4xf32>
    %6 = vector.shape_cast %5 : vector<1x8x8x4xf32> to vector<8x8x4xf32>
    %7 = vector.shape_cast %6 : vector<8x8x4xf32> to vector<8x1x8x4xf32>
    %8 = vector.broadcast %7 : vector<8x1x8x4xf32> to vector<8x2x8x4xf32>
    %9 = vector.shape_cast %8 : vector<8x2x8x4xf32> to vector<16x8x4xf32>
    %10 = vector.extract_strided_slice %9 {offsets = [0, 0, 0], sizes = [16, 1, 4], strides = [1, 1, 1]} : vector<16x8x4xf32> to vector<16x1x4xf32>
    %11 = vector.shape_cast %10 : vector<16x1x4xf32> to vector<16x1x4xf32>
    %12 = vector.broadcast %11 : vector<16x1x4xf32> to vector<16x2x4xf32>
    %c1_12 = arith.constant 1 : index
    %c1_13 = arith.constant 1 : index
    %c4 = arith.constant 4 : index
    %13 = vector.load %arg6[%c1_12, %c1_13, %c4] : memref<18x18x128xf32, #tpu.memory_space<vmem>>, vector<16x2x4xf32>
    tpu.vector_store %arg6[%c1_12, %c1_13, %c4], %12 {strides = array<i32>} : memref<18x18x128xf32, #tpu.memory_space<vmem>>, vector<16x2x4xf32>,
    %14 = vector.extract_strided_slice %9 {offsets = [0, 1, 0], sizes = [16, 1, 4], strides = [1, 1, 1]} : vector<16x8x4xf32> to vector<16x1x4xf32>
    %15 = vector.shape_cast %14 : vector<16x1x4xf32> to vector<16x1x4xf32>
    %16 = vector.broadcast %15 : vector<16x1x4xf32> to vector<16x2x4xf32>
    %c1_14 = arith.constant 1 : index
    %c3 = arith.constant 3 : index
    %c4_15 = arith.constant 4 : index
    %17 = vector.load %arg6[%c1_14, %c3, %c4_15] : memref<18x18x128xf32, #tpu.memory_space<vmem>>, vector<16x2x4xf32>
    tpu.vector_store %arg6[%c1_14, %c3, %c4_15], %16 {strides = array<i32>} : memref<18x18x128xf32, #tpu.memory_space<vmem>>, vector<16x2x4xf32>,
    %18 = vector.extract_strided_slice %9 {offsets = [0, 2, 0], sizes = [16, 1, 4], strides = [1, 1, 1]} : vector<16x8x4xf32> to vector<16x1x4xf32>
    %19 = vector.shape_cast %18 : vector<16x1x4xf32> to vector<16x1x4xf32>
    %20 = vector.broadcast %19 : vector<16x1x4xf32> to vector<16x2x4xf32>
    %c1_16 = arith.constant 1 : index
    %c5 = arith.constant 5 : index
    %c4_17 = arith.constant 4 : index
    %21 = vector.load %arg6[%c1_16, %c5, %c4_17] : memref<18x18x128xf32, #tpu.memory_space<vmem>>, vector<16x2x4xf32>
    tpu.vector_store %arg6[%c1_16, %c5, %c4_17], %20 {strides = array<i32>} : memref<18x18x128xf32, #tpu.memory_space<vmem>>, vector<16x2x4xf32>,
    %22 = vector.extract_strided_slice %9 {offsets = [0, 3, 0], sizes = [16, 1, 4], strides = [1, 1, 1]} : vector<16x8x4xf32> to vector<16x1x4xf32>
    %23 = vector.shape_cast %22 : vector<16x1x4xf32> to vector<16x1x4xf32>
    %24 = vector.broadcast %23 : vector<16x1x4xf32> to vector<16x2x4xf32>
    %c1_18 = arith.constant 1 : index
    %c7 = arith.constant 7 : index
    %c4_19 = arith.constant 4 : index
    %25 = vector.load %arg6[%c1_18, %c7, %c4_19] : memref<18x18x128xf32, #tpu.memory_space<vmem>>, vector<16x2x4xf32>
    tpu.vector_store %arg6[%c1_18, %c7, %c4_19], %24 {strides = array<i32>} : memref<18x18x128xf32, #tpu.memory_space<vmem>>, vector<16x2x4xf32>,
    %26 = vector.extract_strided_slice %9 {offsets = [0, 4, 0], sizes = [16, 1, 4], strides = [1, 1, 1]} : vector<16x8x4xf32> to vector<16x1x4xf32>
    %27 = vector.shape_cast %26 : vector<16x1x4xf32> to vector<16x1x4xf32>
    %28 = vector.broadcast %27 : vector<16x1x4xf32> to vector<16x2x4xf32>
    %c1_20 = arith.constant 1 : index
    %c9 = arith.constant 9 : index
    %c4_21 = arith.constant 4 : index
    %29 = vector.load %arg6[%c1_20, %c9, %c4_21] : memref<18x18x128xf32, #tpu.memory_space<vmem>>, vector<16x2x4xf32>
    tpu.vector_store %arg6[%c1_20, %c9, %c4_21], %28 {strides = array<i32>} : memref<18x18x128xf32, #tpu.memory_space<vmem>>, vector<16x2x4xf32>,
    %30 = vector.extract_strided_slice %9 {offsets = [0, 5, 0], sizes = [16, 1, 4], strides = [1, 1, 1]} : vector<16x8x4xf32> to vector<16x1x4xf32>
    %31 = vector.shape_cast %30 : vector<16x1x4xf32> to vector<16x1x4xf32>
    %32 = vector.broadcast %31 : vector<16x1x4xf32> to vector<16x2x4xf32>
    %c1_22 = arith.constant 1 : index
    %c11 = arith.constant 11 : index
    %c4_23 = arith.constant 4 : index
    %33 = vector.load %arg6[%c1_22, %c11, %c4_23] : memref<18x18x128xf32, #tpu.memory_space<vmem>>, vector<16x2x4xf32>
    tpu.vector_store %arg6[%c1_22, %c11, %c4_23], %32 {strides = array<i32>} : memref<18x18x128xf32, #tpu.memory_space<vmem>>, vector<16x2x4xf32>,
    %34 = vector.extract_strided_slice %9 {offsets = [0, 6, 0], sizes = [16, 1, 4], strides = [1, 1, 1]} : vector<16x8x4xf32> to vector<16x1x4xf32>
    %35 = vector.shape_cast %34 : vector<16x1x4xf32> to vector<16x1x4xf32>
    %36 = vector.broadcast %35 : vector<16x1x4xf32> to vector<16x2x4xf32>
    %c1_24 = arith.constant 1 : index
    %c13 = arith.constant 13 : index
    %c4_25 = arith.constant 4 : index
    %37 = vector.load %arg6[%c1_24, %c13, %c4_25] : memref<18x18x128xf32, #tpu.memory_space<vmem>>, vector<16x2x4xf32>
    tpu.vector_store %arg6[%c1_24, %c13, %c4_25], %36 {strides = array<i32>} : memref<18x18x128xf32, #tpu.memory_space<vmem>>, vector<16x2x4xf32>,
    %38 = vector.extract_strided_slice %9 {offsets = [0, 7, 0], sizes = [16, 1, 4], strides = [1, 1, 1]} : vector<16x8x4xf32> to vector<16x1x4xf32>
    %39 = vector.shape_cast %38 : vector<16x1x4xf32> to vector<16x1x4xf32>
    %40 = vector.broadcast %39 : vector<16x1x4xf32> to vector<16x2x4xf32>
    %c1_26 = arith.constant 1 : index
    %c15 = arith.constant 15 : index
    %c4_27 = arith.constant 4 : index
    %41 = vector.load %arg6[%c1_26, %c15, %c4_27] : memref<18x18x128xf32, #tpu.memory_space<vmem>>, vector<16x2x4xf32>
    tpu.vector_store %arg6[%c1_26, %c15, %c4_27], %40 {strides = array<i32>} : memref<18x18x128xf32, #tpu.memory_space<vmem>>, vector<16x2x4xf32>,
    %cst_28 = arith.constant 0.000000e+00 : f32
    %42 = vector.broadcast %cst_28 : f32 to vector<256x128xf32>
    %c0_29 = arith.constant 0 : index
    %c0_30 = arith.constant 0 : index
    %c0_31 = arith.constant 0 : index
    %43 = vector.load %arg6[%c0_29, %c0_30, %c0_31] : memref<18x18x128xf32, #tpu.memory_space<vmem>>, vector<18x16x128xf32>
    %44 = arith.truncf %43 : vector<18x16x128xf32> to vector<18x16x128xbf16>
    %45 = vector.extract_strided_slice %44 {offsets = [0, 0, 0], sizes = [16, 16, 128], strides = [1, 1, 1]} : vector<18x16x128xbf16> to vector<16x16x128xbf16>
    %46 = vector.shape_cast %45 : vector<16x16x128xbf16> to vector<256x128xbf16>
    %c0_32 = arith.constant 0 : index
    %c0_33 = arith.constant 0 : index
    %c0_34 = arith.constant 0 : index
    %47 = vector.load %arg3[%c0_32, %c0_33, %c0_34] : memref<9x128x128xbf16, #tpu.memory_space<vmem>>, vector<1x128x128xbf16>
    %48 = vector.shape_cast %47 : vector<1x128x128xbf16> to vector<128x128xbf16>
    %cst_35 = arith.constant dense<0.000000e+00> : vector<256x128xf32>
    %49 = tpu.matmul %46, %48, %cst_35 {dimension_numbers = #tpu.dot_dimension_numbers<[1], [0], [0], [1], [0, 0, 1, 1], [], []>} : vector<256x128xbf16>, vector<128x128xbf16>, vector<256x128xf32> -> vector<256x128xf32>
    %50 = arith.addf %42, %49 : vector<256x128xf32>
    %51 = vector.extract_strided_slice %44 {offsets = [1, 0, 0], sizes = [16, 16, 128], strides = [1, 1, 1]} : vector<18x16x128xbf16> to vector<16x16x128xbf16>
    %52 = vector.shape_cast %51 : vector<16x16x128xbf16> to vector<256x128xbf16>
    %c3_36 = arith.constant 3 : index
    %c0_37 = arith.constant 0 : index
    %c0_38 = arith.constant 0 : index
    %53 = vector.load %arg3[%c3_36, %c0_37, %c0_38] : memref<9x128x128xbf16, #tpu.memory_space<vmem>>, vector<1x128x128xbf16>
    %54 = vector.shape_cast %53 : vector<1x128x128xbf16> to vector<128x128xbf16>
    %cst_39 = arith.constant dense<0.000000e+00> : vector<256x128xf32>
    %55 = tpu.matmul %52, %54, %cst_39 {dimension_numbers = #tpu.dot_dimension_numbers<[1], [0], [0], [1], [0, 0, 1, 1], [], []>} : vector<256x128xbf16>, vector<128x128xbf16>, vector<256x128xf32> -> vector<256x128xf32>
    %56 = arith.addf %50, %55 : vector<256x128xf32>
    %57 = vector.extract_strided_slice %44 {offsets = [2, 0, 0], sizes = [16, 16, 128], strides = [1, 1, 1]} : vector<18x16x128xbf16> to vector<16x16x128xbf16>
    %58 = vector.shape_cast %57 : vector<16x16x128xbf16> to vector<256x128xbf16>
    %c6 = arith.constant 6 : index
    %c0_40 = arith.constant 0 : index
    %c0_41 = arith.constant 0 : index
    %59 = vector.load %arg3[%c6, %c0_40, %c0_41] : memref<9x128x128xbf16, #tpu.memory_space<vmem>>, vector<1x128x128xbf16>
    %60 = vector.shape_cast %59 : vector<1x128x128xbf16> to vector<128x128xbf16>
    %cst_42 = arith.constant dense<0.000000e+00> : vector<256x128xf32>
    %61 = tpu.matmul %58, %60, %cst_42 {dimension_numbers = #tpu.dot_dimension_numbers<[1], [0], [0], [1], [0, 0, 1, 1], [], []>} : vector<256x128xbf16>, vector<128x128xbf16>, vector<256x128xf32> -> vector<256x128xf32>
    %62 = arith.addf %56, %61 : vector<256x128xf32>
    %c0_43 = arith.constant 0 : index
    %c1_44 = arith.constant 1 : index
    %c0_45 = arith.constant 0 : index
    %63 = vector.load %arg6[%c0_43, %c1_44, %c0_45] : memref<18x18x128xf32, #tpu.memory_space<vmem>>, vector<18x16x128xf32>
    %64 = arith.truncf %63 : vector<18x16x128xf32> to vector<18x16x128xbf16>
    %65 = vector.extract_strided_slice %64 {offsets = [0, 0, 0], sizes = [16, 16, 128], strides = [1, 1, 1]} : vector<18x16x128xbf16> to vector<16x16x128xbf16>
    %66 = vector.shape_cast %65 : vector<16x16x128xbf16> to vector<256x128xbf16>
    %c1_46 = arith.constant 1 : index
    %c0_47 = arith.constant 0 : index
    %c0_48 = arith.constant 0 : index
    %67 = vector.load %arg3[%c1_46, %c0_47, %c0_48] : memref<9x128x128xbf16, #tpu.memory_space<vmem>>, vector<1x128x128xbf16>
    %68 = vector.shape_cast %67 : vector<1x128x128xbf16> to vector<128x128xbf16>
    %cst_49 = arith.constant dense<0.000000e+00> : vector<256x128xf32>
    %69 = tpu.matmul %66, %68, %cst_49 {dimension_numbers = #tpu.dot_dimension_numbers<[1], [0], [0], [1], [0, 0, 1, 1], [], []>} : vector<256x128xbf16>, vector<128x128xbf16>, vector<256x128xf32> -> vector<256x128xf32>
    %70 = arith.addf %62, %69 : vector<256x128xf32>
    %71 = vector.extract_strided_slice %64 {offsets = [1, 0, 0], sizes = [16, 16, 128], strides = [1, 1, 1]} : vector<18x16x128xbf16> to vector<16x16x128xbf16>
    %72 = vector.shape_cast %71 : vector<16x16x128xbf16> to vector<256x128xbf16>
    %c4_50 = arith.constant 4 : index
    %c0_51 = arith.constant 0 : index
    %c0_52 = arith.constant 0 : index
    %73 = vector.load %arg3[%c4_50, %c0_51, %c0_52] : memref<9x128x128xbf16, #tpu.memory_space<vmem>>, vector<1x128x128xbf16>
    %74 = vector.shape_cast %73 : vector<1x128x128xbf16> to vector<128x128xbf16>
    %cst_53 = arith.constant dense<0.000000e+00> : vector<256x128xf32>
    %75 = tpu.matmul %72, %74, %cst_53 {dimension_numbers = #tpu.dot_dimension_numbers<[1], [0], [0], [1], [0, 0, 1, 1], [], []>} : vector<256x128xbf16>, vector<128x128xbf16>, vector<256x128xf32> -> vector<256x128xf32>
    %76 = arith.addf %70, %75 : vector<256x128xf32>
    %77 = vector.extract_strided_slice %64 {offsets = [2, 0, 0], sizes = [16, 16, 128], strides = [1, 1, 1]} : vector<18x16x128xbf16> to vector<16x16x128xbf16>
    %78 = vector.shape_cast %77 : vector<16x16x128xbf16> to vector<256x128xbf16>
    %c7_54 = arith.constant 7 : index
    %c0_55 = arith.constant 0 : index
    %c0_56 = arith.constant 0 : index
    %79 = vector.load %arg3[%c7_54, %c0_55, %c0_56] : memref<9x128x128xbf16, #tpu.memory_space<vmem>>, vector<1x128x128xbf16>
    %80 = vector.shape_cast %79 : vector<1x128x128xbf16> to vector<128x128xbf16>
    %cst_57 = arith.constant dense<0.000000e+00> : vector<256x128xf32>
    %81 = tpu.matmul %78, %80, %cst_57 {dimension_numbers = #tpu.dot_dimension_numbers<[1], [0], [0], [1], [0, 0, 1, 1], [], []>} : vector<256x128xbf16>, vector<128x128xbf16>, vector<256x128xf32> -> vector<256x128xf32>
    %82 = arith.addf %76, %81 : vector<256x128xf32>
    %c0_58 = arith.constant 0 : index
    %c2 = arith.constant 2 : index
    %c0_59 = arith.constant 0 : index
    %83 = vector.load %arg6[%c0_58, %c2, %c0_59] : memref<18x18x128xf32, #tpu.memory_space<vmem>>, vector<18x16x128xf32>
    %84 = arith.truncf %83 : vector<18x16x128xf32> to vector<18x16x128xbf16>
    %85 = vector.extract_strided_slice %84 {offsets = [0, 0, 0], sizes = [16, 16, 128], strides = [1, 1, 1]} : vector<18x16x128xbf16> to vector<16x16x128xbf16>
    %86 = vector.shape_cast %85 : vector<16x16x128xbf16> to vector<256x128xbf16>
    %c2_60 = arith.constant 2 : index
    %c0_61 = arith.constant 0 : index
    %c0_62 = arith.constant 0 : index
    %87 = vector.load %arg3[%c2_60, %c0_61, %c0_62] : memref<9x128x128xbf16, #tpu.memory_space<vmem>>, vector<1x128x128xbf16>
    %88 = vector.shape_cast %87 : vector<1x128x128xbf16> to vector<128x128xbf16>
    %cst_63 = arith.constant dense<0.000000e+00> : vector<256x128xf32>
    %89 = tpu.matmul %86, %88, %cst_63 {dimension_numbers = #tpu.dot_dimension_numbers<[1], [0], [0], [1], [0, 0, 1, 1], [], []>} : vector<256x128xbf16>, vector<128x128xbf16>, vector<256x128xf32> -> vector<256x128xf32>
    %90 = arith.addf %82, %89 : vector<256x128xf32>
    %91 = vector.extract_strided_slice %84 {offsets = [1, 0, 0], sizes = [16, 16, 128], strides = [1, 1, 1]} : vector<18x16x128xbf16> to vector<16x16x128xbf16>
    %92 = vector.shape_cast %91 : vector<16x16x128xbf16> to vector<256x128xbf16>
    %c5_64 = arith.constant 5 : index
    %c0_65 = arith.constant 0 : index
    %c0_66 = arith.constant 0 : index
    %93 = vector.load %arg3[%c5_64, %c0_65, %c0_66] : memref<9x128x128xbf16, #tpu.memory_space<vmem>>, vector<1x128x128xbf16>
    %94 = vector.shape_cast %93 : vector<1x128x128xbf16> to vector<128x128xbf16>
    %cst_67 = arith.constant dense<0.000000e+00> : vector<256x128xf32>
    %95 = tpu.matmul %92, %94, %cst_67 {dimension_numbers = #tpu.dot_dimension_numbers<[1], [0], [0], [1], [0, 0, 1, 1], [], []>} : vector<256x128xbf16>, vector<128x128xbf16>, vector<256x128xf32> -> vector<256x128xf32>
    %96 = arith.addf %90, %95 : vector<256x128xf32>
    %97 = vector.extract_strided_slice %84 {offsets = [2, 0, 0], sizes = [16, 16, 128], strides = [1, 1, 1]} : vector<18x16x128xbf16> to vector<16x16x128xbf16>
    %98 = vector.shape_cast %97 : vector<16x16x128xbf16> to vector<256x128xbf16>
    %c8 = arith.constant 8 : index
    %c0_68 = arith.constant 0 : index
    %c0_69 = arith.constant 0 : index
    %99 = vector.load %arg3[%c8, %c0_68, %c0_69] : memref<9x128x128xbf16, #tpu.memory_space<vmem>>, vector<1x128x128xbf16>
    %100 = vector.shape_cast %99 : vector<1x128x128xbf16> to vector<128x128xbf16>
    %cst_70 = arith.constant dense<0.000000e+00> : vector<256x128xf32>
    %101 = tpu.matmul %98, %100, %cst_70 {dimension_numbers = #tpu.dot_dimension_numbers<[1], [0], [0], [1], [0, 0, 1, 1], [], []>} : vector<256x128xbf16>, vector<128x128xbf16>, vector<256x128xf32> -> vector<256x128xf32>
    %102 = arith.addf %96, %101 : vector<256x128xf32>
    %c0_71 = arith.constant 0 : index
    %c0_72 = arith.constant 0 : index
    %103 = vector.load %arg4[%c0_71, %c0_72] : memref<1x128xf32, #tpu.memory_space<vmem>>, vector<1x128xf32>
    %104 = vector.broadcast %103 : vector<1x128xf32> to vector<256x128xf32>
    %105 = arith.addf %102, %104 : vector<256x128xf32>
    %cst_73 = arith.constant dense<0.000000e+00> : vector<128xf32>
    %106 = vector.multi_reduction <add>, %105, %cst_73 [0] : vector<256x128xf32> to vector<128xf32>
    %107 = vector.shape_cast %106 : vector<128xf32> to vector<1x128xf32>
    %cst_74 = arith.constant 2.560000e+02 : f32
    %108 = vector.broadcast %cst_74 : f32 to vector<1x128xf32>
    %109 = arith.divf %107, %108 : vector<1x128xf32>
    %110 = vector.broadcast %109 : vector<1x128xf32> to vector<256x128xf32>
    %111 = arith.subf %105, %110 : vector<256x128xf32>
    %112 = arith.mulf %111, %111 : vector<256x128xf32>
    %cst_75 = arith.constant dense<0.000000e+00> : vector<128xf32>
    %113 = vector.multi_reduction <add>, %112, %cst_75 [0] : vector<256x128xf32> to vector<128xf32>
    %114 = vector.shape_cast %113 : vector<128xf32> to vector<1x128xf32>
    %cst_76 = arith.constant 2.560000e+02 : f32
    %115 = vector.broadcast %cst_76 : f32 to vector<1x128xf32>
    %116 = arith.divf %114, %115 : vector<1x128xf32>
    %117 = vector.broadcast %109 : vector<1x128xf32> to vector<256x128xf32>
    %118 = arith.subf %105, %117 : vector<256x128xf32>
    %cst_77 = arith.constant 9.99999974E-6 : f32
    %119 = vector.broadcast %cst_77 : f32 to vector<1x128xf32>
    %120 = arith.addf %116, %119 : vector<1x128xf32>
    %121 = math.rsqrt %120 : vector<1x128xf32>
    %122 = vector.broadcast %121 : vector<1x128xf32> to vector<256x128xf32>
    %123 = arith.mulf %118, %122 : vector<256x128xf32>
    %cst_78 = arith.constant 0.000000e+00 : f32
    %124 = vector.broadcast %cst_78 : f32 to vector<256x128xf32>
    %125 = arith.cmpf ogt, %123, %124 : vector<256x128xf32>
    %cst_79 = arith.constant 0.00999999977 : f32
    %126 = vector.broadcast %cst_79 : f32 to vector<256x128xf32>
    %127 = arith.mulf %126, %123 : vector<256x128xf32>
    %128 = arith.select %125, %123, %127 : vector<256x128xi1>, vector<256x128xf32>
    %c0_80 = arith.constant 0 : index
    %c0_81 = arith.constant 0 : index
    %c0_82 = arith.constant 0 : index
    %129 = vector.load %arg5[%c0_80, %c0_81, %c0_82] : memref<1x256x128xf32, #tpu.memory_space<vmem>>, vector<1x256x128xf32>
    %130 = vector.shape_cast %129 : vector<1x256x128xf32> to vector<256x128xf32>
    %131 = vector.shape_cast %128 : vector<256x128xf32> to vector<1x256x128xf32>
    tpu.vector_store %arg5[%c0_80, %c0_81, %c0_82], %131 {strides = array<i32>} : memref<1x256x128xf32, #tpu.memory_space<vmem>>, vector<1x256x128xf32>,
    return
  }
  func.func @transform_0(%arg0: i32) -> (i32, i32, i32, i32) {
    %c0_i32 = arith.constant 0 : i32
    %c0_i32_0 = arith.constant 0 : i32
    %c0_i32_1 = arith.constant 0 : i32
    %c0_i32_2 = arith.constant 0 : i32
    return %arg0, %c0_i32, %c0_i32_0, %c0_i32_1 : i32, i32, i32, i32
  }
  func.func @transform_1(%arg0: i32) -> (i32, i32, i32, i32) {
    %c0_i32 = arith.constant 0 : i32
    %c0_i32_0 = arith.constant 0 : i32
    %c0_i32_1 = arith.constant 0 : i32
    %c0_i32_2 = arith.constant 0 : i32
    return %arg0, %c0_i32, %c0_i32_0, %c0_i32_1 : i32, i32, i32, i32
  }
  func.func @transform_2(%arg0: i32) -> (i32, i32, i32) {
    %c0_i32 = arith.constant 0 : i32
    %c0_i32_0 = arith.constant 0 : i32
    %c0_i32_1 = arith.constant 0 : i32
    %c0_i32_2 = arith.constant 0 : i32
    return %c0_i32, %c0_i32_0, %c0_i32_1 : i32, i32, i32
  }
  func.func @transform_3(%arg0: i32) -> (i32, i32) {
    %c0_i32 = arith.constant 0 : i32
    %c0_i32_0 = arith.constant 0 : i32
    %c0_i32_1 = arith.constant 0 : i32
    return %c0_i32, %c0_i32_0 : i32, i32
  }
  func.func @transform_4(%arg0: i32) -> (i32, i32, i32) {
    %c0_i32 = arith.constant 0 : i32
    %c0_i32_0 = arith.constant 0 : i32
    %c0_i32_1 = arith.constant 0 : i32
    return %arg0, %c0_i32, %c0_i32_0 : i32, i32, i32
  }
}

</mosaic_0001>

<bundles_post_ra>
// kernel: tpu_custom_call.1
= control target key start
LH: loop header
LB: loop body
LE: loop exit
PB: predicated region body
PF: predicated region fallthrough
CT: control target
= control target key end

     0   :  { %9 = vsyncpa [#allocation4], 0  ;;  %s6841_s0 = inlined_call_operand.vmem [shape: f32[2,8,8,4], index: 0, kind: input, shape index: {}]   ;;  %s6842_s1 = inlined_call_operand.vmem [shape: f32[2,16,16,4], index: 1, kind: input, shape index: {}]   ;;  %s6843_s2 = inlined_call_operand.vmem [shape: bf16[9,128,128], index: 2, kind: input, shape index: {}]   ;;  %s6844_s3 = inlined_call_operand.vmem [shape: f32[1,128], index: 3, kind: input, shape index: {}]   ;;  %s6845_s4 = inlined_call_operand.hbm [shape: f32[2,256,128], index: 4, kind: output, shape index: {}]  }
   0x1   :  { %11 = vsyncpa [#allocation4 + $0x1], 0  ;;  %s5193_s15 = smov 0   ;;  %s5195_s16 = smov 0  }
   0x2   :  { %s5197_s17 = smov 0   ;;  %s5199_s18 = smov 0  }
   0x3 LB: > { %s5214_s19 = sadd.s32 4294967295, %s5161_s18   ;;  %s3835_s20 = sadd.s32 4294967294, %s5161_s18   ;;  %s5161_s18 = sphi %s5199_s18, %s6864_s18   ;;  %s5157_s17 = sphi %s5197_s17, %s6863_s17   ;;  %s5153_s16 = sphi %s5195_s16, %s6862_s16   ;;  %s5149_s15 = sphi %s5193_s15, %s6861_s15  }
   0x4   : > { %s5218_s21 = sadd.s32 1, %s5161_s18   ;;  %s118_s22 = sadd.s32 1, %s5157_s17 }
   0x5   : > { %s115_s23 = ssub.s32 %s5161_s18, %s5218_s21  ;;  %p128_p0 = scmp.ne.s32.totalorder %s5157_s17, %s5153_s16 }
   0x6   : > { %p116_p1 = scmp.eq.s32.totalorder %s115_s23, 0  ;;  %p129_p2 = scmp.eq.s32.totalorder %s5214_s19, 1 }
   0x7   : > { %p134_p3 = scmp.ne.s32.totalorder %s5153_s16, %s5149_s15  ;;  %p135_p4 = scmp.eq.s32.totalorder %s3835_s20, 1 }
   0x8   : > { %s5229_s24 = scalar_select %p116_p1, %s5157_s17, %s118_s22  }
   0x9   : > { %p5231_p5 = por %p129_p2, %p128_p0  ;;  %p5235_p6 = por %p135_p4, %p134_p3 }
   0xa   : > { %p3838_p7 = scmp.ge.s32.totalorder %s5161_s18, 1  ;;  %p175_p8 = scmp.lt.s32.totalorder %s5161_s18, 3 }
   0xc   : > { %p176_p9 = pnand %p3838_p7, %p175_p8 }
   0xd   : > { %p206_p10 = scmp.lt.s32.totalorder (!%p176_p9), %s5214_s19, 1  ;;  %v345_v0 = vlaneseq (!%p176_p9)  ;;  %v5245_v1 = vld [vmem:[%s6843_s2 + $0xc0] sm:$0xff] (!%p176_p9)   ;;  %v5260_v4 = vld [vmem:[%s6843_s2 + $0xc8] sm:$0xff] (!%p176_p9)   ;;  %v5163_v5 = vmov (!%p176_p9), 0.0   ;;  %v5020_v14 = vld [vmem:[%s6843_s2 + $0xd0] sm:$0xff] (!%p176_p9)   ;;  %vm304_vm0 = vcmask (!%p176_p9), 31744  }
   0xe   : > { %179 = sbr.rel (%p176_p9) target bundleno = 890 (0x37a), region = 36  ;;  %v5255_v3 = vld [vmem:[%s6843_s2 + $0x100] sm:$0xff] (!%p176_p9)   ;;  %220 = vst [vmem:[#allocation2 + $0x18] sm:$0xff] (!%p176_p9), %v5163_v5  ;;  %221 = vst [vmem:[#allocation2 + $0x20] sm:$0xff] (!%p176_p9), %v5163_v5  ;;  %4269 = vmatprep.subr.bf16.mxu1 (!%p176_p9), %v5245_v1  ;;  %v5019_v10 = vld [vmem:[%s6843_s2 + $0x108] sm:$0xff] (!%p176_p9)   ;;  %vm409_vm1 = vcmask (!%p176_p9), 58400  }
   0xf   : > { %v5250_v2 = vshrl.u32 (!%p176_p9), %v345_v0, 7  ;;  %223 = vst [vmem:[#allocation2 + $0x30] sm:$0xff] (!%p176_p9), %v5163_v5  ;;  %224 = vst [vmem:[#allocation2 + $0x38] sm:$0xff] (!%p176_p9), %v5163_v5  ;;  %4461 = vmatprep.subr.bf16.mxu0 (!%p176_p9), %v5255_v3  ;;  %4270 = vmatpush3.bf16.msra.mxu1 (!%p176_p9), %v5245_v1  ;;  %v5021_v22 = vld [vmem:[%s6843_s2 + $0x110] sm:$0xff] (!%p176_p9)   ;;  %v5022_v26 = vld [vmem:[%s6843_s2 + $0xd8] sm:$0xff] (!%p176_p9)   ;;  %s203_s6 = sand.u32 (!%p176_p9), 1, %s5153_s16  }
  0x10   : > { %217 = vst [vmem:[#allocation2] sm:$0xff] (!%p176_p9), %v5163_v5  ;;  %218 = vst [vmem:[#allocation2 + $0x8] sm:$0xff] (!%p176_p9), %v5163_v5  ;;  %4462 = vmatpush3.bf16.msra.mxu0 (!%p176_p9), %v5255_v3  ;;  %4271 = vmatprep.subr.bf16.mxu1 (!%p176_p9), %v5260_v4  ;;  %v5023_v31 = vld [vmem:[%s6843_s2 + $0x118] sm:$0xff] (!%p176_p9)   ;;  %v5024_v51 = vld [vmem:[%s6843_s2 + $0xe0] sm:$0xff] (!%p176_p9)   ;;  %s3839_s7 = sshll.u32 (!%p176_p9), %s203_s6, 8  ;;  %s6800_s14 = scalar_lea.sflag (!%p176_p9), [#allocation4], %s203_s6 }
  0x11   : > { %219 = vst [vmem:[#allocation2 + $0x10] sm:$0x3] (!%p176_p9), %v5163_v5  ;;  %222 = vst [vmem:[#allocation2 + $0x28] sm:$0x3] (!%p176_p9), %v5163_v5  ;;  %v5266_v6 = vsub.s32 (!%p176_p9), 2, %v5250_v2  ;;  %v5269_v7 = vsub.s32 (!%p176_p9), 0, %v5250_v2  ;;  %4463 = vmatprep.subr.bf16.mxu0 (!%p176_p9), %v5019_v10 }
  0x12   : > { %225 = vst [vmem:[#allocation2 + $0x40] sm:$0x3] (!%p176_p9), %v5163_v5  ;;  %226 = vst [vmem:[#allocation2 + $0x48] sm:$0xff] (!%p176_p9), %v5163_v5  ;;  %v5279_v8 = vsub.s32 (!%p176_p9), 3, %v5250_v2  ;;  %v5282_v9 = vsub.s32 (!%p176_p9), 1, %v5250_v2  ;;  %v5312_v17 = vsub.s32 (!%p176_p9), 5, %v5250_v2 }
  0x13   : > { %227 = vst [vmem:[#allocation2 + $0x50] sm:$0xff] (!%p176_p9), %v5163_v5  ;;  %228 = vst [vmem:[#allocation2 + $0x58] sm:$0x3] (!%p176_p9), %v5163_v5  ;;  %4272 = vmatpush3.bf16.msra.mxu1 (!%p176_p9), %v5260_v4  ;;  %v5315_v18 = vsub.s32 (!%p176_p9), 4, %v5250_v2  ;;  %v5318_v19 = vsub.s32 (!%p176_p9), 7, %v5250_v2  ;;  %v5331_v24 = vsub.s32 (!%p176_p9), 6, %v5250_v2 }
  0x14   : > { %229 = vst [vmem:[#allocation2 + $0x60] sm:$0xff] (!%p176_p9), %v5163_v5  ;;  %230 = vst [vmem:[#allocation2 + $0x68] sm:$0xff] (!%p176_p9), %v5163_v5  ;;  %4464 = vmatpush3.bf16.msra.mxu0 (!%p176_p9), %v5019_v10  ;;  %4273 = vmatprep.subr.bf16.mxu1 (!%p176_p9), %v5020_v14  ;;  %v5025_v56 = vld [vmem:[%s6843_s2 + $0x120] sm:$0xff] (!%p176_p9)   ;;  %v5026_v61 = vld [vmem:[%s6843_s2 + $0xe8] sm:$0xff] (!%p176_p9)   ;;  %s5165_s20 = smov (!%p176_p9), [#allocation3]  }
  0x15   : > { %s5248_s29 = scalar_select %p206_p10, %s5214_s19, 1  ;;  %231 = vst [vmem:[#allocation2 + $0x70] sm:$0x3] %v5163_v5  ;;  %232 = vst [vmem:[#allocation2 + $0x78] sm:$0xff] %v5163_v5  ;;  %4465 = vmatprep.subr.bf16.mxu0 %v5021_v22 }
  0x16   : > { %233 = vst [vmem:[#allocation2 + $0x80] sm:$0xff] %v5163_v5  ;;  %234 = vst [vmem:[#allocation2 + $0x88] sm:$0x3] %v5163_v5 }
  0x17   : > { %235 = vst [vmem:[#allocation2 + $0x90] sm:$0xff] %v5163_v5  ;;  %236 = vst [vmem:[#allocation2 + $0x98] sm:$0xff] %v5163_v5  ;;  %s4050_s8 = sshll.u32 %s5248_s29, 6  ;;  %s4051_s9 = sshll.u32 %s5248_s29, 8  ;;  %4274 = vmatpush3.bf16.msra.mxu1 %v5020_v14 }
  0x18   : > { %237 = vst [vmem:[#allocation2 + $0xa0] sm:$0x3] %v5163_v5  ;;  %238 = vst [vmem:[#allocation2 + $0xa8] sm:$0xff] %v5163_v5  ;;  %s5276_s12 = scalar_lea.vmem %s6841_s0, %s4050_s8  ;;  %s5295_s23 = scalar_lea.vmem %s6842_s1, %s4051_s9  ;;  %4466 = vmatpush3.bf16.msra.mxu0 %v5021_v22  ;;  %4275 = vmatprep.subr.bf16.mxu1 %v5022_v26 }
  0x19   : > { %239 = vst [vmem:[#allocation2 + $0xb0] sm:$0xff] %v5163_v5  ;;  %240 = vst [vmem:[#allocation2 + $0xb8] sm:$0x3] %v5163_v5  ;;  %v5290_v11 = vld [vmem:[%s5276_s12] sm:$0xff]  ;;  %s5164_s29 = smov 4   ;;  %v5321_v20 = vld [vmem:[%s5276_s12 + $0x8] sm:$0xff]  ;;  %4467 = vmatprep.subr.bf16.mxu0 %v5023_v31 }
  0x1a   : > { %241 = vst [vmem:[#allocation2 + $0xc0] sm:$0xff] %v5163_v5  ;;  %242 = vst [vmem:[#allocation2 + $0xc8] sm:$0xff] %v5163_v5  ;;  %v509_v12 = vrot.slane %v5290_v11, %v5266_v6  ;;  %v348_v13 = vrot.slane %v5290_v11, %v5269_v7  ;;  %v589_v15 = vrot.slane %v5290_v11, %v5279_v8  ;;  %v5324_v21 = vld [vmem:[%s5276_s12 + $0x20] sm:$0xff]  ;;  %v273_v25 = vld [vmem:[%s5295_s23 + $0x10] sm:$0xff]  ;;  %s6513_s8 = scalar_lea.vmem [#allocation3], %s3839_s7  ;;  %s4052_s9 = sshll.u32 %s5214_s19, 12 }
  0x1b   : > { %243 = vst [vmem:[#allocation2 + $0xd0] sm:$0x3] %v5163_v5  ;;  %244 = vst [vmem:[#allocation2 + $0xd8] sm:$0xff] %v5163_v5  ;;  %v429_v16 = vrot.slane %v5290_v11, %v5282_v9  ;;  %v271_v23 = vld [vmem:[%s5295_s23] sm:$0xff]  ;;  %v749_v27 = vrot.slane %v5290_v11, %v5312_v17  ;;  %v669_v28 = vrot.slane %v5290_v11, %v5315_v18  ;;  %v5346_v29 = vld [vmem:[%s5276_s12 + $0x28] sm:$0xff]  ;;  %4276 = vmatpush3.bf16.msra.mxu1 %v5022_v26  ;;  %s3761_s10 = sshll.u32 %s6513_s8, 4  ;;  %s6770_s13 = scalar_lea.hbm %s6845_s4, %s4052_s9  ;;  %s6772_s10 = int_to_ptr.vmem [resolvable:$true] %s3761_s10 }
  0x1c   : > { %245 = vst [vmem:[#allocation2 + $0xe0] sm:$0xff] %v5163_v5  ;;  %246 = vst [vmem:[#allocation2 + $0xe8] sm:$0x3] %v5163_v5  ;;  %546 = vrot.lane.b32.xlu1 %v509_v12, %s5164_s29  ;;  %385 = vrot.lane.b32.xlu0 %v348_v13, %s5164_s29  ;;  %v909_v30 = vrot.slane %v5290_v11, %v5318_v19  ;;  %v829_v32 = vrot.slane %v5290_v11, %v5331_v24  ;;  %v5362_v36 = vld [vmem:[%s5276_s12 + $0x30] sm:$0xff]  ;;  %v272_v37 = vld [vmem:[%s5295_s23 + $0x8] sm:$0xff] }
  0x1d   : > { %247 = vst [vmem:[#allocation2 + $0xf0] sm:$0xff] %v5163_v5  ;;  %248 = vst [vmem:[#allocation2 + $0xf8] sm:$0xff] %v5163_v5  ;;  %v433_v33 = vrot.slane %v5321_v20, %v5282_v9  ;;  %v352_v34 = vrot.slane %v5321_v20, %v5269_v7  ;;  %v364_v35 = vrot.slane %v5324_v21, %v5269_v7  ;;  %v274_v42 = vld [vmem:[%s5295_s23 + $0x18] sm:$0xff]  ;;  %4468 = vmatpush3.bf16.msra.mxu0 %v5023_v31  ;;  %v275_v62 = vld [vmem:[%s5295_s23 + $0x20] sm:$0xff] }
  0x1e   : > { %249 = vst [vmem:[#allocation2 + $0x100] sm:$0x3] %v5163_v5  ;;  %250 = vst [vmem:[#allocation2 + $0x108] sm:$0xff] %v5163_v5  ;;  %v605_v38 = vrot.slane %v5324_v21, %v5279_v8  ;;  %v525_v39 = vrot.slane %v5324_v21, %v5266_v6  ;;  %v765_v40 = vrot.slane %v5324_v21, %v5312_v17  ;;  %v5384_v46 = vld [vmem:[%s5276_s12 + $0x38] sm:$0xff]  ;;  %v277_v2 = vld [vmem:[%s5295_s23 + $0x30] sm:$0xff]  ;;  %4277 = vmatprep.subr.bf16.mxu1 %v5024_v51 }
  0x1f   : > { %251 = vst [vmem:[#allocation2 + $0x110] sm:$0xff] %v5163_v5  ;;  %252 = vst [vmem:[#allocation2 + $0x118] sm:$0x3] %v5163_v5  ;;  %v685_v41 = vrot.slane %v5324_v21, %v5315_v18  ;;  %v925_v43 = vrot.slane %v5324_v21, %v5318_v19  ;;  %v845_v44 = vrot.slane %v5324_v21, %v5331_v24  ;;  %v5027_v11 = vld [vmem:[%s6843_s2 + $0x128] sm:$0xff]   ;;  %4469 = vmatprep.subr.bf16.mxu0 %v5025_v56  ;;  %v279_v26 = vld [vmem:[%s5295_s23 + $0x40] sm:$0xff] }
  0x20   : > { %253 = vst [vmem:[#allocation2 + $0x120] sm:$0xff] %v5163_v5  ;;  %254 = vst [vmem:[#allocation2 + $0x128] sm:$0xff] %v5163_v5  ;;  %626 = vrot.lane.b32.xlu1 %v589_v15, %s5164_s29  ;;  %466 = vrot.lane.b32.xlu0 %v429_v16, %s5164_s29  ;;  %v449_v45 = vrot.slane %v5346_v29, %v5282_v9  ;;  %v368_v47 = vrot.slane %v5346_v29, %v5269_v7  ;;  %v5028_v15 = vld [vmem:[%s6843_s2 + $0xf0] sm:$0xff]   ;;  %v276_v16 = vld [vmem:[%s5295_s23 + $0x28] sm:$0xff] }
  0x21   : > { %255 = vst [vmem:[#allocation2 + $0x130] sm:$0x3] %v5163_v5  ;;  %256 = vst [vmem:[#allocation2 + $0x138] sm:$0xff] %v5163_v5  ;;  %v609_v48 = vrot.slane %v5346_v29, %v5279_v8  ;;  %v529_v49 = vrot.slane %v5346_v29, %v5266_v6  ;;  %v769_v50 = vrot.slane %v5346_v29, %v5312_v17  ;;  %4278 = vmatpush3.bf16.msra.mxu1 %v5024_v51  ;;  %v5030_v31 = vld [vmem:[%s6843_s2 + $0xf8] sm:$0xff]  }
  0x22   : > { %257 = vst [vmem:[#allocation2 + $0x140] sm:$0xff] %v5163_v5  ;;  %258 = vst [vmem:[#allocation2 + $0x148] sm:$0x3] %v5163_v5  ;;  %v689_v52 = vrot.slane %v5346_v29, %v5315_v18  ;;  %v929_v53 = vrot.slane %v5346_v29, %v5318_v19  ;;  %v849_v54 = vrot.slane %v5346_v29, %v5331_v24  ;;  %4470 = vmatpush3.bf16.msra.mxu0 %v5025_v56  ;;  %v280_v56 = vld [vmem:[%s5295_s23 + $0x48] sm:$0xff] }
  0x23   : > { %259 = vst [vmem:[#allocation2 + $0x150] sm:$0xff] %v5163_v5  ;;  %260 = vst [vmem:[#allocation2 + $0x158] sm:$0xff] %v5163_v5  ;;  %v453_v55 = vrot.slane %v5362_v36, %v5282_v9  ;;  %v372_v57 = vrot.slane %v5362_v36, %v5269_v7  ;;  %v613_v58 = vrot.slane %v5362_v36, %v5279_v8  ;;  %4279 = vmatprep.subr.bf16.mxu1 %v5026_v61  ;;  %v300_v29 = vld [vmem:[%s5295_s23 + $0xe8] sm:$0xff] }
  0x24   : > { %261 = vst [vmem:[#allocation2 + $0x160] sm:$0x3] %v5163_v5  ;;  %262 = vst [vmem:[#allocation2 + $0x168] sm:$0xff] %v5163_v5  ;;  %786 = vrot.lane.b32.xlu1 %v749_v27, %s5164_s29  ;;  %706 = vrot.lane.b32.xlu0 %v669_v28, %s5164_s29  ;;  %v533_v59 = vrot.slane %v5362_v36, %v5266_v6  ;;  %v773_v60 = vrot.slane %v5362_v36, %v5312_v17  ;;  %v281_v27 = vld [vmem:[%s5295_s23 + $0x50] sm:$0xff] }
  0x25   : > { %263 = vst [vmem:[#allocation2 + $0x170] sm:$0xff] %v5163_v5  ;;  %264 = vst [vmem:[#allocation2 + $0x178] sm:$0x3] %v5163_v5  ;;  %v693_v63 = vrot.slane %v5362_v36, %v5315_v18  ;;  %v933_v0 = vrot.slane %v5362_v36, %v5318_v19  ;;  %v853_v1 = vrot.slane %v5362_v36, %v5331_v24  ;;  %4471 = vmatprep.subr.bf16.mxu0 %v5027_v11 }
  0x26   : > { %265 = vst [vmem:[#allocation2 + $0x180] sm:$0xff] %v5163_v5  ;;  %266 = vst [vmem:[#allocation2 + $0x188] sm:$0xff] %v5163_v5  ;;  %v457_v3 = vrot.slane %v5384_v46, %v5282_v9  ;;  %v376_v4 = vrot.slane %v5384_v46, %v5269_v7  ;;  %v537_v10 = vrot.slane %v5384_v46, %v5266_v6  ;;  %4280 = vmatpush3.bf16.msra.mxu1 %v5026_v61  ;;  %v282_v61 = vld [vmem:[%s5295_s23 + $0x58] sm:$0xff] }
  0x27   : > { %267 = vst [vmem:[#allocation2 + $0x190] sm:$0x3] %v5163_v5  ;;  %268 = vst [vmem:[#allocation2 + $0x198] sm:$0xff] %v5163_v5  ;;  %v777_v12 = vrot.slane %v5384_v46, %v5312_v17  ;;  %v697_v13 = vrot.slane %v5384_v46, %v5315_v18  ;;  %v937_v14 = vrot.slane %v5384_v46, %v5318_v19  ;;  %4472 = vmatpush3.bf16.msra.mxu0 %v5027_v11  ;;  %v283_v11 = vld [vmem:[%s5295_s23 + $0x60] sm:$0xff] }
  0x28   : > { %269 = vst [vmem:[#allocation2 + $0x1a0] sm:$0xff] %v5163_v5  ;;  %270 = vst [vmem:[#allocation2 + $0x1a8] sm:$0x3] %v5163_v5  ;;  %946 = vrot.lane.b32.xlu1 %v909_v30, %s5164_s29  ;;  %866 = vrot.lane.b32.xlu0 %v829_v32, %s5164_s29  ;;  %v617_v5 = vrot.slane %v5384_v46, %v5279_v8  ;;  %v857_v22 = vrot.slane %v5384_v46, %v5331_v24  ;;  %v5031_v32 = vld [vmem:[%s6843_s2 + $0x138] sm:$0xff]  }
  0x29   : > { %305 = vst.msk [vmem:[#allocation2 + $0x19] sm:$0xff] %vm304_vm0, %v271_v23  ;;  %307 = vst.msk [vmem:[#allocation2 + $0x31] sm:$0xff] %vm304_vm0, %v273_v25  ;;  %v5029_v23 = vld [vmem:[%s6843_s2 + $0x130] sm:$0xff]   ;;  %v278_v25 = vld [vmem:[%s5295_s23 + $0x38] sm:$0xff]  ;;  %v593_v28 = vrot.slane %v5321_v20, %v5279_v8  ;;  %v513_v30 = vrot.slane %v5321_v20, %v5266_v6  ;;  %4281 = vmatprep.subr.bf16.mxu1 %v5028_v15  ;;  %v833_v51 = vrot.slane %v5321_v20, %v5331_v24 }
  0x2a   : > { %306 = vst.msk [vmem:[#allocation2 + $0x21] sm:$0xff] %vm304_vm0, %v272_v37  ;;  %308 = vst.msk [vmem:[#allocation2 + $0x39] sm:$0xff] %vm304_vm0, %v274_v42  ;;  %4473 = vmatprep.subr.bf16.mxu0 %v5029_v23  ;;  %4282 = vmatpush3.bf16.msra.mxu1 %v5028_v15  ;;  %v339_v37 = vld [vmem:[%s5276_s12 + $0x10] sm:$0xff]  ;;  %v913_v42 = vrot.slane %v5321_v20, %v5318_v19 }
  0x2b   : > { %309 = vst.msk [vmem:[#allocation2 + $0x49] sm:$0xff] %vm304_vm0, %v275_v62  ;;  %311 = vst.msk [vmem:[#allocation2 + $0x61] sm:$0xff] %vm304_vm0, %v277_v2  ;;  %4474 = vmatpush3.bf16.msra.mxu0 %v5029_v23  ;;  %4283 = vmatprep.subr.bf16.mxu1 %v5030_v31  ;;  %v437_v62 = vrot.slane %v339_v37, %v5282_v9  ;;  %v356_v2 = vrot.slane %v339_v37, %v5269_v7  ;;  %v285_v15 = vld [vmem:[%s5295_s23 + $0x70] sm:$0xff] }
  0x2c   : > { %310 = vst.msk [vmem:[#allocation2 + $0x51] sm:$0xff] %vm304_vm0, %v276_v16  ;;  %468 = vrot.lane.b32.xlu1 %v433_v33, %s5164_s29  ;;  %387 = vrot.lane.b32.xlu0 %v352_v34, %s5164_s29  ;;  %312 = vst.msk [vmem:[#allocation2 + $0x69] sm:$0xff] %vm304_vm0, %v278_v25  ;;  %v753_v33 = vrot.slane %v5321_v20, %v5312_v17  ;;  %v673_v34 = vrot.slane %v5321_v20, %v5315_v18  ;;  %v5507_v20 = vld [vmem:[%s6843_s2 + $0x1c0] sm:$0xff]  }
  0x2d   : > { %313 = vst.msk [vmem:[#allocation2 + $0x79] sm:$0xff] %vm304_vm0, %v279_v26  ;;  %315 = vst.msk [vmem:[#allocation2 + $0x91] sm:$0xff] %vm304_vm0, %v281_v27  ;;  %4475 = vmatprep.subr.bf16.mxu0 %v5031_v32  ;;  %v597_v16 = vrot.slane %v339_v37, %v5279_v8  ;;  %v517_v23 = vrot.slane %v339_v37, %v5266_v6  ;;  %v757_v25 = vrot.slane %v339_v37, %v5312_v17 }
  0x2e   : > { %4284 = vmatpush3.bf16.msra.mxu1 %v5030_v31  ;;  %314 = vst.msk [vmem:[#allocation2 + $0x81] sm:$0xff] %vm304_vm0, %v280_v56  ;;  %316 = vst.msk [vmem:[#allocation2 + $0x99] sm:$0xff] %vm304_vm0, %v282_v61  ;;  %v677_v26 = vrot.slane %v339_v37, %v5315_v18  ;;  %v917_v27 = vrot.slane %v339_v37, %v5318_v19  ;;  %v284_v31 = vld [vmem:[%s5295_s23 + $0x68] sm:$0xff] }
  0x2f   : > { %4476 = vmatpush3.bf16.msra.mxu0 %v5031_v32  ;;  %317 = vst.msk [vmem:[#allocation2 + $0xa9] sm:$0xff] %vm304_vm0, %v283_v11  ;;  %319 = vst.msk [vmem:[#allocation2 + $0xc1] sm:$0xff] %vm304_vm0, %v285_v15  ;;  %v286_v32 = vld [vmem:[%s5295_s23 + $0x78] sm:$0xff]  ;;  %v288_v15 = vld [vmem:[%s5295_s23 + $0x88] sm:$0xff] }
  0x30   : > { %628 = vrot.lane.b32.xlu1 %v593_v28, %s5164_s29  ;;  %548 = vrot.lane.b32.xlu0 %v513_v30, %s5164_s29  ;;  %v837_v28 = vrot.slane %v339_v37, %v5331_v24  ;;  %v340_v30 = vld [vmem:[%s5276_s12 + $0x18] sm:$0xff]  ;;  %318 = vst.msk [vmem:[#allocation2 + $0xb1] sm:$0xff] %vm304_vm0, %v284_v31  ;;  %320 = vst.msk [vmem:[#allocation2 + $0xc9] sm:$0xff] %vm304_vm0, %v286_v32  ;;  %v5036_v31 = vld [vmem:[%s6843_s2 + $0x1e0] sm:$0xff]   ;;  %s5099_s12 = scalar_lea.vmem %s6772_s10, 4096 }
  0x31   : > { %4509 = vmatprep.subr.bf16.mxu0 %v5507_v20  ;;  %v601_v37 = vrot.slane %v340_v30, %v5279_v8  ;;  %v521_v56 = vrot.slane %v340_v30, %v5266_v6  ;;  %v761_v61 = vrot.slane %v340_v30, %v5312_v17  ;;  %v841_v11 = vrot.slane %v340_v30, %v5331_v24  ;;  %v5044_v32 = vld [vmem:[%s6843_s2 + $0x20] sm:$0xff]   ;;  %p5100_p11 = scmp.ne.s32.totalorder %s6772_s10, %s5099_s12 }
  0x32   : > { %322 = vst.msk [vmem:[#allocation2 + $0xe1] sm:$0xff] %vm304_vm0, %v288_v15  ;;  %334 = vst.msk [vmem:[#allocation2 + $0x171] sm:$0xff] %vm304_vm0, %v300_v29 }
  0x33   : > { %p5101_p12 = pnand %p5100_p11, %p5231_p5 }
  0x34   : > { %788 = vrot.lane.b32.xlu1 %v753_v33, %s5164_s29  ;;  %708 = vrot.lane.b32.xlu0 %v673_v34, %s5164_s29  ;;  %v441_v33 = vrot.slane %v340_v30, %v5282_v9  ;;  %v360_v34 = vrot.slane %v340_v30, %v5269_v7 }
  0x35   : > { %p5102_p13 = pneg %p5101_p12 }
  0x38   : > { %948 = vrot.lane.b32.xlu1 %v913_v42, %s5164_s29  ;;  %868 = vrot.lane.b32.xlu0 %v833_v51, %s5164_s29  ;;  %v287_v42 = vld [vmem:[%s5295_s23 + $0x80] sm:$0xff]  ;;  %v289_v51 = vld [vmem:[%s5295_s23 + $0x90] sm:$0xff] }
  0x39   : > { %321 = vst.msk [vmem:[#allocation2 + $0xd9] sm:$0xff] %vm304_vm0, %v287_v42  ;;  %323 = vst.msk [vmem:[#allocation2 + $0xf1] sm:$0xff] %vm304_vm0, %v289_v51 }
  0x3c   : > { %470 = vrot.lane.b32.xlu1 %v437_v62, %s5164_s29  ;;  %389 = vrot.lane.b32.xlu0 %v356_v2, %s5164_s29  ;;  %v681_v62 = vrot.slane %v340_v30, %v5315_v18  ;;  %v921_v2 = vrot.slane %v340_v30, %v5318_v19 }
  0x40   : > { %630 = vrot.lane.b32.xlu1 %v597_v16, %s5164_s29  ;;  %550 = vrot.lane.b32.xlu0 %v517_v23, %s5164_s29  ;;  %v290_v16 = vld [vmem:[%s5295_s23 + $0x98] sm:$0xff]  ;;  %v445_v23 = vrot.slane %v5324_v21, %v5282_v9  ;;  %v296_v21 = vld [vmem:[%s5295_s23 + $0xc8] sm:$0xff] }
  0x41   : > { %324 = vst.msk [vmem:[#allocation2 + $0xf9] sm:$0xff] %vm304_vm0, %v290_v16  ;;  %330 = vst.msk [vmem:[#allocation2 + $0x141] sm:$0xff] %vm304_vm0, %v296_v21 }
  0x44   : > { %790 = vrot.lane.b32.xlu1 %v757_v25, %s5164_s29  ;;  %710 = vrot.lane.b32.xlu0 %v677_v26, %s5164_s29  ;;  %v5562_v25 = vld [vmem:[%s6843_s2] sm:$0xff]  }
  0x45   : > { %v291_v26 = vld [vmem:[%s5295_s23 + $0xa0] sm:$0xff]  ;;  %4317 = vmatprep.subr.bf16.mxu1 %v5562_v25 }
  0x46   : > { %325 = vst.msk [vmem:[#allocation2 + $0x109] sm:$0xff] %vm304_vm0, %v291_v26  ;;  %v5037_v26 = vld [vmem:[%s6843_s2 + $0x1e8] sm:$0xff]  }
  0x48   : > { %950 = vrot.lane.b32.xlu1 %v917_v27, %s5164_s29  ;;  %870 = vrot.lane.b32.xlu0 %v837_v28, %s5164_s29  ;;  %v293_v27 = vld [vmem:[%s5295_s23 + $0xb0] sm:$0xff]  ;;  %v294_v28 = vld [vmem:[%s5295_s23 + $0xb8] sm:$0xff] }
  0x49   : > { %327 = vst.msk [vmem:[#allocation2 + $0x121] sm:$0xff] %vm304_vm0, %v293_v27  ;;  %328 = vst.msk [vmem:[#allocation2 + $0x129] sm:$0xff] %vm304_vm0, %v294_v28  ;;  %v5046_v27 = vld [vmem:[%s6843_s2 + $0x28] sm:$0xff]  }
  0x4c   : > { %472 = vrot.lane.b32.xlu1 %v441_v33, %s5164_s29  ;;  %391 = vrot.lane.b32.xlu0 %v360_v34, %s5164_s29 }
  0x50   : > { %632 = vrot.lane.b32.xlu1 %v601_v37, %s5164_s29  ;;  %552 = vrot.lane.b32.xlu0 %v521_v56, %s5164_s29 }
  0x54   : > { %792 = vrot.lane.b32.xlu1 %v761_v61, %s5164_s29  ;;  %712 = vrot.lane.b32.xlu0 %v681_v62, %s5164_s29 }
  0x58   : > { %952 = vrot.lane.b32.xlu1 %v921_v2, %s5164_s29  ;;  %872 = vrot.lane.b32.xlu0 %v841_v11, %s5164_s29 }
  0x5c   : > { %474 = vrot.lane.b32.xlu1 %v445_v23, %s5164_s29  ;;  %393 = vrot.lane.b32.xlu0 %v364_v35, %s5164_s29  ;;  %v292_v35 = vld [vmem:[%s5295_s23 + $0xa8] sm:$0xff] }
  0x5d   : > { %326 = vst.msk [vmem:[#allocation2 + $0x111] sm:$0xff] %vm304_vm0, %v292_v35 }
  0x60   : > { %634 = vrot.lane.b32.xlu1 %v605_v38, %s5164_s29  ;;  %554 = vrot.lane.b32.xlu0 %v525_v39, %s5164_s29  ;;  %v295_v38 = vld [vmem:[%s5295_s23 + $0xc0] sm:$0xff]  ;;  %v297_v39 = vld [vmem:[%s5295_s23 + $0xd0] sm:$0xff] }
  0x61   : > { %329 = vst.msk [vmem:[#allocation2 + $0x139] sm:$0xff] %vm304_vm0, %v295_v38  ;;  %331 = vst.msk [vmem:[#allocation2 + $0x151] sm:$0xff] %vm304_vm0, %v297_v39  ;;  %v5038_v38 = vld [vmem:[%s6843_s2 + $0x1f0] sm:$0xff]  }
  0x62   : > { %v5048_v39 = vld [vmem:[%s6843_s2 + $0x30] sm:$0xff]  }
  0x64   : > { %794 = vrot.lane.b32.xlu1 %v765_v40, %s5164_s29  ;;  %714 = vrot.lane.b32.xlu0 %v685_v41, %s5164_s29  ;;  %v298_v40 = vld [vmem:[%s5295_s23 + $0xd8] sm:$0xff]  ;;  %v299_v41 = vld [vmem:[%s5295_s23 + $0xe0] sm:$0xff] }
  0x65   : > { %332 = vst.msk [vmem:[#allocation2 + $0x159] sm:$0xff] %vm304_vm0, %v298_v40  ;;  %333 = vst.msk [vmem:[#allocation2 + $0x169] sm:$0xff] %vm304_vm0, %v299_v41  ;;  %v5039_v41 = vld [vmem:[%s6843_s2 + $0x1f8] sm:$0xff]  }
  0x68   : > { %954 = vrot.lane.b32.xlu1 %v925_v43, %s5164_s29  ;;  %874 = vrot.lane.b32.xlu0 %v845_v44, %s5164_s29  ;;  %v301_v43 = vld [vmem:[%s5295_s23 + $0xf0] sm:$0xff]  ;;  %v302_v44 = vld [vmem:[%s5295_s23 + $0xf8] sm:$0xff]  ;;  %s5103_s23 = sshll.u32 %s5165_s20, 4  ;;  %s5104_s23 = int_to_ptr.vmem [resolvable:$false] %s5103_s23 }
  0x69   : > { %335 = vst.msk [vmem:[#allocation2 + $0x181] sm:$0xff] %vm304_vm0, %v301_v43  ;;  %336 = vst.msk [vmem:[#allocation2 + $0x189] sm:$0xff] %vm304_vm0, %v302_v44  ;;  %v5051_v43 = vld [vmem:[%s6843_s2 + $0x38] sm:$0xff]   ;;  %p5106_p0 = scmp.lt.s32.totalorder %s6772_s10, %s5104_s23 }
  0x6c   : > { %476 = vrot.lane.b32.xlu1 %v449_v45, %s5164_s29  ;;  %395 = vrot.lane.b32.xlu0 %v368_v47, %s5164_s29 }
  0x70   : > { %636 = vrot.lane.b32.xlu1 %v609_v48, %s5164_s29  ;;  %556 = vrot.lane.b32.xlu0 %v529_v49, %s5164_s29 }
  0x74   : > { %796 = vrot.lane.b32.xlu1 %v769_v50, %s5164_s29  ;;  %716 = vrot.lane.b32.xlu0 %v689_v52, %s5164_s29 }
  0x78   : > { %956 = vrot.lane.b32.xlu1 %v929_v53, %s5164_s29  ;;  %876 = vrot.lane.b32.xlu0 %v849_v54, %s5164_s29 }
  0x7c   : > { %478 = vrot.lane.b32.xlu1 %v453_v55, %s5164_s29  ;;  %397 = vrot.lane.b32.xlu0 %v372_v57, %s5164_s29 }
  0x80   : > { %638 = vrot.lane.b32.xlu1 %v613_v58, %s5164_s29  ;;  %558 = vrot.lane.b32.xlu0 %v533_v59, %s5164_s29 }
  0x84   : > { %798 = vrot.lane.b32.xlu1 %v773_v60, %s5164_s29  ;;  %718 = vrot.lane.b32.xlu0 %v693_v63, %s5164_s29 }
  0x88   : > { %958 = vrot.lane.b32.xlu1 %v933_v0, %s5164_s29  ;;  %878 = vrot.lane.b32.xlu0 %v853_v1, %s5164_s29  ;;  %v5033_v0 = vld [vmem:[%s6843_s2 + $0x1c8] sm:$0xff]  }
  0x89   : > { %v5041_v1 = vld [vmem:[%s6843_s2 + $0x8] sm:$0xff]  }
  0x8c   : > { %480 = vrot.lane.b32.xlu1 %v457_v3, %s5164_s29  ;;  %399 = vrot.lane.b32.xlu0 %v376_v4, %s5164_s29 }
  0x8e   : > { %v547_v45 = vpop.permute.xlu1 %546  ;;  %v386_v47 = vpop.permute.xlu0 %385 }
  0x8f   : > { %570 = vst.msk [vmem:[#allocation2 + $0x1d] sm:$0x3] %vm409_vm1, %v547_v45  ;;  %571 = vst.msk [vmem:[#allocation2 + $0x35] sm:$0x3] %vm409_vm1, %v547_v45  ;;  %v5837_v45 = vld [vmem:[%s6843_s2 + $0x80] sm:$0xff]  }
  0x90   : > { %410 = vst.msk [vmem:[#allocation2 + $0x19] sm:$0x3] %vm409_vm1, %v386_v47  ;;  %411 = vst.msk [vmem:[#allocation2 + $0x31] sm:$0x3] %vm409_vm1, %v386_v47  ;;  %640 = vrot.lane.b32.xlu1 %v617_v5, %s5164_s29  ;;  %560 = vrot.lane.b32.xlu0 %v537_v10, %s5164_s29  ;;  %v5034_v5 = vld [vmem:[%s6843_s2 + $0x1d0] sm:$0xff]   ;;  %v5842_v47 = vld [vmem:[%s6843_s2 + $0x180] sm:$0xff]  }
  0x91   : > { %v5042_v10 = vld [vmem:[%s6843_s2 + $0x10] sm:$0xff]  }
  0x92   : > { %v627_v7 = vpop.permute.xlu1 %626  ;;  %v467_v9 = vpop.permute.xlu0 %466 }
  0x93   : > { %650 = vst.msk [vmem:[#allocation2 + $0x1f] sm:$0x3] %vm409_vm1, %v627_v7  ;;  %651 = vst.msk [vmem:[#allocation2 + $0x37] sm:$0x3] %vm409_vm1, %v627_v7 }
  0x94   : > { %490 = vst.msk [vmem:[#allocation2 + $0x1b] sm:$0x3] %vm409_vm1, %v467_v9  ;;  %491 = vst.msk [vmem:[#allocation2 + $0x33] sm:$0x3] %vm409_vm1, %v467_v9  ;;  %800 = vrot.lane.b32.xlu1 %v777_v12, %s5164_s29  ;;  %720 = vrot.lane.b32.xlu0 %v697_v13, %s5164_s29 }
  0x96   : > { %v787_v6 = vpop.permute.xlu1 %786  ;;  %v707_v8 = vpop.permute.xlu0 %706 }
  0x97   : > { %810 = vst.msk [vmem:[#allocation2 + $0x23] sm:$0x3] %vm409_vm1, %v787_v6  ;;  %811 = vst.msk [vmem:[#allocation2 + $0x3b] sm:$0x3] %vm409_vm1, %v787_v6 }
  0x98   : > { %730 = vst.msk [vmem:[#allocation2 + $0x21] sm:$0x3] %vm409_vm1, %v707_v8  ;;  %731 = vst.msk [vmem:[#allocation2 + $0x39] sm:$0x3] %vm409_vm1, %v707_v8  ;;  %960 = vrot.lane.b32.xlu1 %v937_v14, %s5164_s29  ;;  %880 = vrot.lane.b32.xlu0 %v857_v22, %s5164_s29  ;;  %v5035_v14 = vld [vmem:[%s6843_s2 + $0x1d8] sm:$0xff]   ;;  %s5105_s29 = scalar_lea.vmem %s5104_s23, 8192 }
  0x99   : > { %v5043_v22 = vld [vmem:[%s6843_s2 + $0x18] sm:$0xff]   ;;  %p5107_p1 = scmp.lt.s32.totalorder %s5105_s29, %s5099_s12 }
  0x9a   : > { %v947_v17 = vpop.permute.xlu1 %946  ;;  %v867_v18 = vpop.permute.xlu0 %866 }
  0x9b   : > { %970 = vst.msk [vmem:[#allocation2 + $0x27] sm:$0x3] %vm409_vm1, %v947_v17  ;;  %971 = vst.msk [vmem:[#allocation2 + $0x3f] sm:$0x3] %vm409_vm1, %v947_v17  ;;  %v988_v19 = vld [vmem:[#allocation2 + $0x18] sm:$0xff]  ;;  %v990_v46 = vld [vmem:[#allocation2 + $0x30] sm:$0xff]  ;;  %p5108_p2 = por %p5107_p1, %p5106_p0 }
  0x9c   : > { %890 = vst.msk [vmem:[#allocation2 + $0x25] sm:$0x3] %vm409_vm1, %v867_v18  ;;  %891 = vst.msk [vmem:[#allocation2 + $0x3d] sm:$0x3] %vm409_vm1, %v867_v18  ;;  %v1751_v24 = vld [vmem:[#allocation2 + $0x19] sm:$0xff]  ;;  %v1753_v59 = vld [vmem:[#allocation2 + $0x31] sm:$0xff] }
  0x9d   : > { %p5109_p3 = pnand %p5108_p2, %p5102_p13 }
  0x9e   : > { %v469_v36 = vpop.permute.xlu1 %468  ;;  %v388_v48 = vpop.permute.xlu0 %387 }
  0x9f   : > { %492 = vst.msk [vmem:[#allocation2 + $0x4b] sm:$0x3] %vm409_vm1, %v469_v36  ;;  %493 = vst.msk [vmem:[#allocation2 + $0x63] sm:$0x3] %vm409_vm1, %v469_v36 }
  0xa0   : > { %412 = vst.msk [vmem:[#allocation2 + $0x49] sm:$0x3] %vm409_vm1, %v388_v48  ;;  %413 = vst.msk [vmem:[#allocation2 + $0x61] sm:$0x3] %vm409_vm1, %v388_v48 }
  0xa2   : > { %v629_v49 = vpop.permute.xlu1 %628  ;;  %v549_v50 = vpop.permute.xlu0 %548 }
  0xa3   : > { %v989_v52 = vld [vmem:[#allocation2 + $0x20] sm:$0xff]  ;;  %v991_v54 = vld [vmem:[#allocation2 + $0x38] sm:$0xff]  ;;  %652 = vst.msk [vmem:[#allocation2 + $0x4f] sm:$0x3] %vm409_vm1, %v629_v49  ;;  %653 = vst.msk [vmem:[#allocation2 + $0x67] sm:$0x3] %vm409_vm1, %v629_v49 }
  0xa4   : > { %v1752_v53 = vld [vmem:[#allocation2 + $0x21] sm:$0xff]  ;;  %572 = vst.msk [vmem:[#allocation2 + $0x4d] sm:$0x3] %vm409_vm1, %v549_v50  ;;  %573 = vst.msk [vmem:[#allocation2 + $0x65] sm:$0x3] %vm409_vm1, %v549_v50  ;;  %v5738_v55 = vpack.c.bf16 %v989_v52, %v988_v19  ;;  %v5742_v58 = vpack.c.bf16 %v991_v54, %v990_v46  ;;  %v1754_v60 = vld [vmem:[#allocation2 + $0x39] sm:$0xff] }
  0xa5   : > { %v5740_v57 = vpack.c.bf16 %v1752_v53, %v1751_v24  ;;  %v5744_v63 = vpack.c.bf16 %v1754_v60, %v1753_v59 }
  0xa6   : > { %4285 = vmatprep.mubr.bf16.mxu1 %v5738_v55  ;;  %v789_v3 = vpop.permute.xlu1 %788  ;;  %v709_v4 = vpop.permute.xlu0 %708 }
  0xa7   : > { %4477 = vmatprep.mubr.bf16.mxu0 %v5740_v57  ;;  %4286 = vmatmul.mubr.bf16.vlgmr.msra.gmra.mrb[0].mxu1 %v5742_v58  ;;  %812 = vst.msk [vmem:[#allocation2 + $0x53] sm:$0x3] %vm409_vm1, %v789_v3  ;;  %813 = vst.msk [vmem:[#allocation2 + $0x6b] sm:$0x3] %vm409_vm1, %v789_v3 }
  0xa8   : > { %4478 = vmatmul.mubr.bf16.vlgmr.msra.gmra.mrb[0].mxu0 %v5744_v63  ;;  %732 = vst.msk [vmem:[#allocation2 + $0x51] sm:$0x3] %vm409_vm1, %v709_v4  ;;  %733 = vst.msk [vmem:[#allocation2 + $0x69] sm:$0x3] %vm409_vm1, %v709_v4  ;;  %4318 = vmatpush3.bf16.msra.mxu1 %v5562_v25 }
  0xa9   : > { %4510 = vmatpush3.bf16.msra.mxu0 %v5507_v20  ;;  %4319 = vmatprep.subr.bf16.mxu1 %v5041_v1 }
  0xaa   : > { %4511 = vmatprep.subr.bf16.mxu0 %v5033_v0  ;;  %v949_v12 = vpop.permute.xlu1 %948  ;;  %v869_v13 = vpop.permute.xlu0 %868 }
  0xab   : > { %972 = vst.msk [vmem:[#allocation2 + $0x57] sm:$0x3] %vm409_vm1, %v949_v12  ;;  %973 = vst.msk [vmem:[#allocation2 + $0x6f] sm:$0x3] %vm409_vm1, %v949_v12  ;;  %v992_v33 = vld [vmem:[#allocation2 + $0x48] sm:$0xff]  ;;  %v994_v42 = vld [vmem:[#allocation2 + $0x60] sm:$0xff] }
  0xac   : > { %892 = vst.msk [vmem:[#allocation2 + $0x55] sm:$0x3] %vm409_vm1, %v869_v13  ;;  %893 = vst.msk [vmem:[#allocation2 + $0x6d] sm:$0x3] %vm409_vm1, %v869_v13  ;;  %4320 = vmatpush3.bf16.msra.mxu1 %v5041_v1  ;;  %v1755_v34 = vld [vmem:[#allocation2 + $0x49] sm:$0xff]  ;;  %v1757_v16 = vld [vmem:[#allocation2 + $0x61] sm:$0xff] }
  0xad   : > { %4512 = vmatpush3.bf16.msra.mxu0 %v5033_v0  ;;  %4321 = vmatprep.subr.bf16.mxu1 %v5042_v10 }
  0xae   : > { %4513 = vmatprep.subr.bf16.mxu0 %v5034_v5  ;;  %v471_v20 = vpop.permute.xlu1 %470  ;;  %v390_v30 = vpop.permute.xlu0 %389 }
  0xaf   : > { %494 = vst.msk [vmem:[#allocation2 + $0x7b] sm:$0x3] %vm409_vm1, %v471_v20  ;;  %495 = vst.msk [vmem:[#allocation2 + $0x93] sm:$0x3] %vm409_vm1, %v471_v20 }
  0xb0   : > { %414 = vst.msk [vmem:[#allocation2 + $0x79] sm:$0x3] %vm409_vm1, %v390_v30  ;;  %415 = vst.msk [vmem:[#allocation2 + $0x91] sm:$0x3] %vm409_vm1, %v390_v30  ;;  %4322 = vmatpush3.bf16.msra.mxu1 %v5042_v10 }
  0xb1   : > { %4514 = vmatpush3.bf16.msra.mxu0 %v5034_v5  ;;  %4323 = vmatprep.subr.bf16.mxu1 %v5043_v22 }
  0xb2   : > { %4515 = vmatprep.subr.bf16.mxu0 %v5035_v14  ;;  %v631_v51 = vpop.permute.xlu1 %630  ;;  %v551_v37 = vpop.permute.xlu0 %550 }
  0xb3   : > { %v993_v56 = vld [vmem:[#allocation2 + $0x50] sm:$0xff]  ;;  %v995_v62 = vld [vmem:[#allocation2 + $0x68] sm:$0xff]  ;;  %654 = vst.msk [vmem:[#allocation2 + $0x7f] sm:$0x3] %vm409_vm1, %v631_v51  ;;  %655 = vst.msk [vmem:[#allocation2 + $0x97] sm:$0x3] %vm409_vm1, %v631_v51 }
  0xb4   : > { %v1756_v61 = vld [vmem:[#allocation2 + $0x51] sm:$0xff]  ;;  %574 = vst.msk [vmem:[#allocation2 + $0x7d] sm:$0x3] %vm409_vm1, %v551_v37  ;;  %575 = vst.msk [vmem:[#allocation2 + $0x95] sm:$0x3] %vm409_vm1, %v551_v37  ;;  %v5792_v2 = vpack.c.bf16 %v993_v56, %v992_v33  ;;  %v5796_v15 = vpack.c.bf16 %v995_v62, %v994_v42  ;;  %v1758_v23 = vld [vmem:[#allocation2 + $0x69] sm:$0xff]  ;;  %4324 = vmatpush3.bf16.msra.mxu1 %v5043_v22 }
  0xb5   : > { %v5794_v11 = vpack.c.bf16 %v1756_v61, %v1755_v34  ;;  %4516 = vmatpush3.bf16.msra.mxu0 %v5035_v14  ;;  %v5798_v25 = vpack.c.bf16 %v1758_v23, %v1757_v16  ;;  %4325 = vmatprep.subr.bf16.mxu1 %v5044_v32  ;;  %v5047_v61 = vld [vmem:[%s6843_s2 + $0x88] sm:$0xff]   ;;  %v5049_v23 = vld [vmem:[%s6843_s2 + $0x90] sm:$0xff]  }
  0xb6   : > { %4517 = vmatprep.subr.bf16.mxu0 %v5036_v31  ;;  %4289 = vmatprep.mubr.bf16.mxu1 %v5792_v2  ;;  %v791_v35 = vpop.permute.xlu1 %790  ;;  %v711_v28 = vpop.permute.xlu0 %710 }
  0xb7   : > { %4481 = vmatprep.mubr.bf16.mxu0 %v5794_v11  ;;  %4290 = vmatmul.mubr.bf16.gmra.mrb[4].mxu1 %v5796_v15  ;;  %814 = vst.msk [vmem:[#allocation2 + $0x83] sm:$0x3] %vm409_vm1, %v791_v35  ;;  %815 = vst.msk [vmem:[#allocation2 + $0x9b] sm:$0x3] %vm409_vm1, %v791_v35 }
  0xb8   : > { %4482 = vmatmul.mubr.bf16.gmra.mrb[4].mxu0 %v5798_v25  ;;  %734 = vst.msk [vmem:[#allocation2 + $0x81] sm:$0x3] %vm409_vm1, %v711_v28  ;;  %735 = vst.msk [vmem:[#allocation2 + $0x99] sm:$0x3] %vm409_vm1, %v711_v28  ;;  %4326 = vmatpush3.bf16.msra.mxu1 %v5044_v32 }
  0xb9   : > { %4518 = vmatpush3.bf16.msra.mxu0 %v5036_v31  ;;  %4327 = vmatprep.subr.bf16.mxu1 %v5046_v27 }
  0xba   : > { %4519 = vmatprep.subr.bf16.mxu0 %v5037_v26  ;;  %v951_v21 = vpop.permute.xlu1 %950  ;;  %v871_v40 = vpop.permute.xlu0 %870 }
  0xbb   : > { %974 = vst.msk [vmem:[#allocation2 + $0x87] sm:$0x3] %vm409_vm1, %v951_v21  ;;  %975 = vst.msk [vmem:[#allocation2 + $0x9f] sm:$0x3] %vm409_vm1, %v951_v21  ;;  %v996_v7 = vld [vmem:[#allocation2 + $0x78] sm:$0xff]  ;;  %v998_v6 = vld [vmem:[#allocation2 + $0x90] sm:$0xff] }
  0xbc   : > { %894 = vst.msk [vmem:[#allocation2 + $0x85] sm:$0x3] %vm409_vm1, %v871_v40  ;;  %895 = vst.msk [vmem:[#allocation2 + $0x9d] sm:$0x3] %vm409_vm1, %v871_v40  ;;  %4328 = vmatpush3.bf16.msra.mxu1 %v5046_v27  ;;  %v1759_v9 = vld [vmem:[#allocation2 + $0x79] sm:$0xff]  ;;  %v1761_v49 = vld [vmem:[#allocation2 + $0x91] sm:$0xff] }
  0xbd   : > { %4520 = vmatpush3.bf16.msra.mxu0 %v5037_v26  ;;  %4329 = vmatprep.subr.bf16.mxu1 %v5048_v39 }
  0xbe   : > { %4521 = vmatprep.subr.bf16.mxu0 %v5038_v38  ;;  %v473_v29 = vpop.permute.xlu1 %472  ;;  %v392_v44 = vpop.permute.xlu0 %391 }
  0xbf   : > { %496 = vst.msk [vmem:[#allocation2 + $0xab] sm:$0x3] %vm409_vm1, %v473_v29  ;;  %497 = vst.msk [vmem:[#allocation2 + $0xc3] sm:$0x3] %vm409_vm1, %v473_v29 }
  0xc0   : > { %416 = vst.msk [vmem:[#allocation2 + $0xa9] sm:$0x3] %vm409_vm1, %v392_v44  ;;  %417 = vst.msk [vmem:[#allocation2 + $0xc1] sm:$0x3] %vm409_vm1, %v392_v44  ;;  %4330 = vmatpush3.bf16.msra.mxu1 %v5048_v39  ;;  %v5052_v44 = vld [vmem:[%s6843_s2 + $0xa0] sm:$0xff]  }
  0xc1   : > { %4522 = vmatpush3.bf16.msra.mxu0 %v5038_v38  ;;  %4331 = vmatprep.subr.bf16.mxu1 %v5051_v43 }
  0xc2   : > { %4523 = vmatprep.subr.bf16.mxu0 %v5039_v41  ;;  %v633_v8 = vpop.permute.xlu1 %632  ;;  %v553_v17 = vpop.permute.xlu0 %552 }
  0xc3   : > { %v997_v18 = vld [vmem:[#allocation2 + $0x80] sm:$0xff]  ;;  %v999_v48 = vld [vmem:[#allocation2 + $0x98] sm:$0xff]  ;;  %656 = vst.msk [vmem:[#allocation2 + $0xaf] sm:$0x3] %vm409_vm1, %v633_v8  ;;  %657 = vst.msk [vmem:[#allocation2 + $0xc7] sm:$0x3] %vm409_vm1, %v633_v8 }
  0xc4   : > { %v1760_v36 = vld [vmem:[#allocation2 + $0x81] sm:$0xff]  ;;  %576 = vst.msk [vmem:[#allocation2 + $0xad] sm:$0x3] %vm409_vm1, %v553_v17  ;;  %577 = vst.msk [vmem:[#allocation2 + $0xc5] sm:$0x3] %vm409_vm1, %v553_v17  ;;  %v5848_v19 = vpack.c.bf16 %v997_v18, %v996_v7  ;;  %v5852_v46 = vpack.c.bf16 %v999_v48, %v998_v6  ;;  %v1762_v50 = vld [vmem:[#allocation2 + $0x99] sm:$0xff]  ;;  %4332 = vmatpush3.bf16.msra.mxu1 %v5051_v43 }
  0xc5   : > { %v5850_v24 = vpack.c.bf16 %v1760_v36, %v1759_v9  ;;  %4524 = vmatpush3.bf16.msra.mxu0 %v5039_v41  ;;  %v5854_v52 = vpack.c.bf16 %v1762_v50, %v1761_v49  ;;  %4365 = vmatprep.subr.bf16.mxu1 %v5842_v47  ;;  %v5050_v41 = vld [vmem:[%s6843_s2 + $0x98] sm:$0xff]   ;;  %v5053_v9 = vld [vmem:[%s6843_s2 + $0xa8] sm:$0xff]   ;;  %v5055_v17 = vld [vmem:[%s6843_s2 + $0xb0] sm:$0xff]  }
  0xc6   : > { %4557 = vmatprep.subr.bf16.mxu0 %v5837_v45  ;;  %4293 = vmatprep.mubr.bf16.mxu1 %v5848_v19  ;;  %v793_v53 = vpop.permute.xlu1 %792  ;;  %v713_v54 = vpop.permute.xlu0 %712 }
  0xc7   : > { %4485 = vmatprep.mubr.bf16.mxu0 %v5850_v24  ;;  %4294 = vmatmul.mubr.bf16.gmra.mrb[8].mxu1 %v5852_v46  ;;  %816 = vst.msk [vmem:[#allocation2 + $0xb3] sm:$0x3] %vm409_vm1, %v793_v53  ;;  %817 = vst.msk [vmem:[#allocation2 + $0xcb] sm:$0x3] %vm409_vm1, %v793_v53 }
  0xc8   : > { %4486 = vmatmul.mubr.bf16.gmra.mrb[8].mxu0 %v5854_v52  ;;  %736 = vst.msk [vmem:[#allocation2 + $0xb1] sm:$0x3] %vm409_vm1, %v713_v54  ;;  %737 = vst.msk [vmem:[#allocation2 + $0xc9] sm:$0x3] %vm409_vm1, %v713_v54 }
  0xca   : > { %v953_v59 = vpop.permute.xlu1 %952  ;;  %v873_v60 = vpop.permute.xlu0 %872 }
  0xcb   : > { %976 = vst.msk [vmem:[#allocation2 + $0xb7] sm:$0x3] %vm409_vm1, %v953_v59  ;;  %977 = vst.msk [vmem:[#allocation2 + $0xcf] sm:$0x3] %vm409_vm1, %v953_v59  ;;  %v1000_v3 = vld [vmem:[#allocation2 + $0xa8] sm:$0xff]  ;;  %v1002_v5 = vld [vmem:[#allocation2 + $0xc0] sm:$0xff] }
  0xcc   : > { %896 = vst.msk [vmem:[#allocation2 + $0xb5] sm:$0x3] %vm409_vm1, %v873_v60  ;;  %897 = vst.msk [vmem:[#allocation2 + $0xcd] sm:$0x3] %vm409_vm1, %v873_v60  ;;  %v1763_v4 = vld [vmem:[#allocation2 + $0xa9] sm:$0xff]  ;;  %v1765_v32 = vld [vmem:[#allocation2 + $0xc1] sm:$0xff] }
  0xce   : > { %v475_v0 = vpop.permute.xlu1 %474  ;;  %v394_v1 = vpop.permute.xlu0 %393 }
  0xcf   : > { %498 = vst.msk [vmem:[#allocation2 + $0xdb] sm:$0x3] %vm409_vm1, %v475_v0  ;;  %499 = vst.msk [vmem:[#allocation2 + $0xf3] sm:$0x3] %vm409_vm1, %v475_v0 }
  0xd0   : > { %418 = vst.msk [vmem:[#allocation2 + $0xd9] sm:$0x3] %vm409_vm1, %v394_v1  ;;  %419 = vst.msk [vmem:[#allocation2 + $0xf1] sm:$0x3] %vm409_vm1, %v394_v1 }
  0xd2   : > { %v635_v10 = vpop.permute.xlu1 %634  ;;  %v555_v12 = vpop.permute.xlu0 %554 }
  0xd3   : > { %v1001_v13 = vld [vmem:[#allocation2 + $0xb0] sm:$0xff]  ;;  %v1003_v22 = vld [vmem:[#allocation2 + $0xc8] sm:$0xff]  ;;  %658 = vst.msk [vmem:[#allocation2 + $0xdf] sm:$0x3] %vm409_vm1, %v635_v10  ;;  %659 = vst.msk [vmem:[#allocation2 + $0xf7] sm:$0x3] %vm409_vm1, %v635_v10 }
  0xd4   : > { %v1764_v14 = vld [vmem:[#allocation2 + $0xb1] sm:$0xff]  ;;  %578 = vst.msk [vmem:[#allocation2 + $0xdd] sm:$0x3] %vm409_vm1, %v555_v12  ;;  %579 = vst.msk [vmem:[#allocation2 + $0xf5] sm:$0x3] %vm409_vm1, %v555_v12  ;;  %v5878_v20 = vpack.c.bf16 %v1001_v13, %v1000_v3  ;;  %v5882_v31 = vpack.c.bf16 %v1003_v22, %v1002_v5  ;;  %v1766_v33 = vld [vmem:[#allocation2 + $0xc9] sm:$0xff] }
  0xd5   : > { %v5880_v30 = vpack.c.bf16 %v1764_v14, %v1763_v4  ;;  %v5884_v34 = vpack.c.bf16 %v1766_v33, %v1765_v32  ;;  %v5056_v5 = vld [vmem:[%s6843_s2 + $0xb8] sm:$0xff]   ;;  %v5976_v14 = vld [vmem:[%s6843_s2 + $0x140] sm:$0xff]  }
  0xd6   : > { %4297 = vmatprep.mubr.bf16.mxu1 %v5878_v20  ;;  %v795_v42 = vpop.permute.xlu1 %794  ;;  %v715_v51 = vpop.permute.xlu0 %714 }
  0xd7   : > { %4489 = vmatprep.mubr.bf16.mxu0 %v5880_v30  ;;  %4298 = vmatmul.mubr.bf16.gmra.mrb[12].mxu1 %v5882_v31  ;;  %818 = vst.msk [vmem:[#allocation2 + $0xe3] sm:$0x3] %vm409_vm1, %v795_v42  ;;  %819 = vst.msk [vmem:[#allocation2 + $0xfb] sm:$0x3] %vm409_vm1, %v795_v42 }
  0xd8   : > { %4490 = vmatmul.mubr.bf16.gmra.mrb[12].mxu0 %v5884_v34  ;;  %738 = vst.msk [vmem:[#allocation2 + $0xe1] sm:$0x3] %vm409_vm1, %v715_v51  ;;  %739 = vst.msk [vmem:[#allocation2 + $0xf9] sm:$0x3] %vm409_vm1, %v715_v51 }
  0xd9   : > { %4525 = vmatprep.mubr.bf16.mxu0 %v5744_v63 }
  0xda   : > { %v955_v37 = vpop.permute.xlu1 %954  ;;  %v875_v56 = vpop.permute.xlu0 %874 }
  0xdb   : > { %978 = vst.msk [vmem:[#allocation2 + $0xe7] sm:$0x3] %vm409_vm1, %v955_v37  ;;  %979 = vst.msk [vmem:[#allocation2 + $0xff] sm:$0x3] %vm409_vm1, %v955_v37  ;;  %v1004_v26 = vld [vmem:[#allocation2 + $0xd8] sm:$0xff]  ;;  %v1006_v38 = vld [vmem:[#allocation2 + $0xf0] sm:$0xff] }
  0xdc   : > { %898 = vst.msk [vmem:[#allocation2 + $0xe5] sm:$0x3] %vm409_vm1, %v875_v56  ;;  %899 = vst.msk [vmem:[#allocation2 + $0xfd] sm:$0x3] %vm409_vm1, %v875_v56  ;;  %v1767_v1 = vld [vmem:[#allocation2 + $0xd9] sm:$0xff]  ;;  %v1769_v4 = vld [vmem:[#allocation2 + $0xf1] sm:$0xff] }
  0xde   : > { %v477_v62 = vpop.permute.xlu1 %476  ;;  %v396_v16 = vpop.permute.xlu0 %395 }
  0xdf   : > { %500 = vst.msk [vmem:[#allocation2 + $0x10b] sm:$0x3] %vm409_vm1, %v477_v62  ;;  %501 = vst.msk [vmem:[#allocation2 + $0x123] sm:$0x3] %vm409_vm1, %v477_v62 }
  0xe0   : > { %4526 = vmatmul.mubr.bf16.vlgmr.msra.gmra.mrb[0].mxu0 %v5794_v11  ;;  %420 = vst.msk [vmem:[#allocation2 + $0x109] sm:$0x3] %vm409_vm1, %v396_v16  ;;  %421 = vst.msk [vmem:[#allocation2 + $0x121] sm:$0x3] %vm409_vm1, %v396_v16 }
  0xe1   : > { %4529 = vmatprep.mubr.bf16.mxu0 %v5798_v25  ;;  %4558 = vmatpush3.bf16.msra.mxu0 %v5837_v45 }
  0xe2   : > { %4559 = vmatprep.subr.bf16.mxu0 %v5047_v61  ;;  %v637_v27 = vpop.permute.xlu1 %636  ;;  %v557_v35 = vpop.permute.xlu0 %556 }
  0xe3   : > { %v1005_v28 = vld [vmem:[#allocation2 + $0xe0] sm:$0xff]  ;;  %v1007_v39 = vld [vmem:[#allocation2 + $0xf8] sm:$0xff]  ;;  %660 = vst.msk [vmem:[#allocation2 + $0x10f] sm:$0x3] %vm409_vm1, %v637_v27  ;;  %661 = vst.msk [vmem:[#allocation2 + $0x127] sm:$0x3] %vm409_vm1, %v637_v27 }
  0xe4   : > { %580 = vst.msk [vmem:[#allocation2 + $0x10d] sm:$0x3] %vm409_vm1, %v557_v35  ;;  %581 = vst.msk [vmem:[#allocation2 + $0x125] sm:$0x3] %vm409_vm1, %v557_v35  ;;  %v5916_v21 = vpack.c.bf16 %v1005_v28, %v1004_v26  ;;  %v5918_v40 = vpack.c.bf16 %v1007_v39, %v1006_v38  ;;  %v1768_v36 = vld [vmem:[#allocation2 + $0xe1] sm:$0xff]  ;;  %v1770_v48 = vld [vmem:[#allocation2 + $0xf9] sm:$0xff] }
  0xe5   : > { %4560 = vmatpush3.bf16.msra.mxu0 %v5047_v61  ;;  %v5958_v3 = vpack.c.bf16 %v1768_v36, %v1767_v1  ;;  %v5964_v10 = vpack.c.bf16 %v1770_v48, %v1769_v4 }
  0xe6   : > { %4561 = vmatprep.subr.bf16.mxu0 %v5049_v23  ;;  %4301 = vmatprep.mubr.bf16.mxu1 %v5916_v21  ;;  %v797_v43 = vpop.permute.xlu1 %796  ;;  %v717_v29 = vpop.permute.xlu0 %716 }
  0xe7   : > { %4302 = vmatmul.mubr.bf16.gmra.mrb[16].mxu1 %v5918_v40  ;;  %820 = vst.msk [vmem:[#allocation2 + $0x113] sm:$0x3] %vm409_vm1, %v797_v43  ;;  %821 = vst.msk [vmem:[#allocation2 + $0x12b] sm:$0x3] %vm409_vm1, %v797_v43 }
  0xe8   : > { %4530 = vmatmul.mubr.bf16.gmra.mrb[4].mxu0 %v5850_v24  ;;  %740 = vst.msk [vmem:[#allocation2 + $0x111] sm:$0x3] %vm409_vm1, %v717_v29  ;;  %741 = vst.msk [vmem:[#allocation2 + $0x129] sm:$0x3] %vm409_vm1, %v717_v29 }
  0xe9   : > { %4533 = vmatprep.mubr.bf16.mxu0 %v5854_v52  ;;  %4562 = vmatpush3.bf16.msra.mxu0 %v5049_v23 }
  0xea   : > { %4563 = vmatprep.subr.bf16.mxu0 %v5050_v41  ;;  %v957_v45 = vpop.permute.xlu1 %956  ;;  %v877_v7 = vpop.permute.xlu0 %876 }
  0xeb   : > { %980 = vst.msk [vmem:[#allocation2 + $0x117] sm:$0x3] %vm409_vm1, %v957_v45  ;;  %981 = vst.msk [vmem:[#allocation2 + $0x12f] sm:$0x3] %vm409_vm1, %v957_v45  ;;  %v1008_v18 = vld [vmem:[#allocation2 + $0x108] sm:$0xff]  ;;  %v1010_v54 = vld [vmem:[#allocation2 + $0x120] sm:$0xff] }
  0xec   : > { %900 = vst.msk [vmem:[#allocation2 + $0x115] sm:$0x3] %vm409_vm1, %v877_v7  ;;  %901 = vst.msk [vmem:[#allocation2 + $0x12d] sm:$0x3] %vm409_vm1, %v877_v7  ;;  %v1771_v51 = vld [vmem:[#allocation2 + $0x109] sm:$0xff]  ;;  %v1773_v56 = vld [vmem:[#allocation2 + $0x121] sm:$0xff] }
  0xed   : > { %4564 = vmatpush3.bf16.msra.mxu0 %v5050_v41 }
  0xee   : > { %4565 = vmatprep.subr.bf16.mxu0 %v5052_v44  ;;  %v479_v6 = vpop.permute.xlu1 %478  ;;  %v398_v8 = vpop.permute.xlu0 %397 }
  0xef   : > { %502 = vst.msk [vmem:[#allocation2 + $0x13b] sm:$0x3] %vm409_vm1, %v479_v6  ;;  %503 = vst.msk [vmem:[#allocation2 + $0x153] sm:$0x3] %vm409_vm1, %v479_v6 }
  0xf0   : > { %4534 = vmatmul.mubr.bf16.gmra.mrb[8].mxu0 %v5880_v30  ;;  %422 = vst.msk [vmem:[#allocation2 + $0x139] sm:$0x3] %vm409_vm1, %v398_v8  ;;  %423 = vst.msk [vmem:[#allocation2 + $0x151] sm:$0x3] %vm409_vm1, %v398_v8 }
  0xf1   : > { %4537 = vmatprep.mubr.bf16.mxu0 %v5884_v34  ;;  %4566 = vmatpush3.bf16.msra.mxu0 %v5052_v44 }
  0xf2   : > { %4567 = vmatprep.subr.bf16.mxu0 %v5053_v9  ;;  %v639_v49 = vpop.permute.xlu1 %638  ;;  %v559_v50 = vpop.permute.xlu0 %558 }
  0xf3   : > { %v1009_v53 = vld [vmem:[#allocation2 + $0x110] sm:$0xff]  ;;  %v1011_v59 = vld [vmem:[#allocation2 + $0x128] sm:$0xff]  ;;  %662 = vst.msk [vmem:[#allocation2 + $0x13f] sm:$0x3] %vm409_vm1, %v639_v49  ;;  %663 = vst.msk [vmem:[#allocation2 + $0x157] sm:$0x3] %vm409_vm1, %v639_v49 }
  0xf4   : > { %582 = vst.msk [vmem:[#allocation2 + $0x13d] sm:$0x3] %vm409_vm1, %v559_v50  ;;  %583 = vst.msk [vmem:[#allocation2 + $0x155] sm:$0x3] %vm409_vm1, %v559_v50  ;;  %v5954_v60 = vpack.c.bf16 %v1009_v53, %v1008_v18  ;;  %v5956_v0 = vpack.c.bf16 %v1011_v59, %v1010_v54  ;;  %v1772_v22 = vld [vmem:[#allocation2 + $0x111] sm:$0xff]  ;;  %v1774_v42 = vld [vmem:[#allocation2 + $0x129] sm:$0xff] }
  0xf5   : > { %4568 = vmatpush3.bf16.msra.mxu0 %v5053_v9  ;;  %v5982_v37 = vpack.c.bf16 %v1772_v22, %v1771_v51  ;;  %v5985_v61 = vpack.c.bf16 %v1774_v42, %v1773_v56  ;;  %v1784_v42 = vld [vmem:[#allocation2 + $0x1a1] sm:$0xff]  ;;  %v2578_v56 = vld [vmem:[#allocation2 + $0xa] sm:$0xff] }
  0xf6   : > { %4569 = vmatprep.subr.bf16.mxu0 %v5055_v17  ;;  %4305 = vmatprep.mubr.bf16.mxu1 %v5954_v60  ;;  %v799_v12 = vpop.permute.xlu1 %798  ;;  %v719_v13 = vpop.permute.xlu0 %718  ;;  %v2577_v51 = vld [vmem:[#allocation2 + $0x2] sm:$0xff] }
  0xf7   : > { %4306 = vmatmul.mubr.bf16.gmra.mrb[20].mxu1 %v5956_v0  ;;  %822 = vst.msk [vmem:[#allocation2 + $0x143] sm:$0x3] %vm409_vm1, %v799_v12  ;;  %823 = vst.msk [vmem:[#allocation2 + $0x15b] sm:$0x3] %vm409_vm1, %v799_v12 }
  0xf8   : > { %4538 = vmatmul.mubr.bf16.gmra.mrb[12].mxu0 %v5958_v3  ;;  %742 = vst.msk [vmem:[#allocation2 + $0x141] sm:$0x3] %vm409_vm1, %v719_v13  ;;  %743 = vst.msk [vmem:[#allocation2 + $0x159] sm:$0x3] %vm409_vm1, %v719_v13  ;;  %v5090_v13 = vld [vmem:[#allocation2] sm:$0xff] }
  0xf9   : > { %4541 = vmatprep.mubr.bf16.mxu0 %v5964_v10  ;;  %4570 = vmatpush3.bf16.msra.mxu0 %v5055_v17  ;;  %v6023_v22 = vpack.c.bf16 %v5090_v13, %v5090_v13 }
  0xfa   : > { %4571 = vmatprep.subr.bf16.mxu0 %v5056_v5  ;;  %v959_v32 = vpop.permute.xlu1 %958  ;;  %v879_v33 = vpop.permute.xlu0 %878 }
  0xfb   : > { %982 = vst.msk [vmem:[#allocation2 + $0x147] sm:$0x3] %vm409_vm1, %v959_v32  ;;  %983 = vst.msk [vmem:[#allocation2 + $0x15f] sm:$0x3] %vm409_vm1, %v959_v32  ;;  %v1012_v23 = vld [vmem:[#allocation2 + $0x138] sm:$0xff]  ;;  %v1014_v26 = vld [vmem:[#allocation2 + $0x150] sm:$0xff] }
  0xfc   : > { %902 = vst.msk [vmem:[#allocation2 + $0x145] sm:$0x3] %vm409_vm1, %v879_v33  ;;  %903 = vst.msk [vmem:[#allocation2 + $0x15d] sm:$0x3] %vm409_vm1, %v879_v33  ;;  %v1775_v27 = vld [vmem:[#allocation2 + $0x139] sm:$0xff]  ;;  %v1777_v7 = vld [vmem:[#allocation2 + $0x151] sm:$0xff] }
  0xfd   : > { %4572 = vmatpush3.bf16.msra.mxu0 %v5056_v5  ;;  %v1783_v33 = vld [vmem:[#allocation2 + $0x199] sm:$0xff] }
  0xfe   : > { %4605 = vmatprep.subr.bf16.mxu0 %v5976_v14  ;;  %v481_v62 = vpop.permute.xlu1 %480  ;;  %v400_v16 = vpop.permute.xlu0 %399 }
  0xff   : > { %504 = vst.msk [vmem:[#allocation2 + $0x16b] sm:$0x3] %vm409_vm1, %v481_v62  ;;  %505 = vst.msk [vmem:[#allocation2 + $0x183] sm:$0x3] %vm409_vm1, %v481_v62  ;;  %v1802_v62 = vpack.c.bf16 %v1784_v42, %v1783_v33  ;;  %v2589_v33 = vld [vmem:[#allocation2 + $0x92] sm:$0xff] }
 0x100   : > { %4542 = vmatmul.mubr.bf16.gmra.mrb[16].mxu0 %v5982_v37  ;;  %424 = vst.msk [vmem:[#allocation2 + $0x169] sm:$0x3] %vm409_vm1, %v400_v16  ;;  %425 = vst.msk [vmem:[#allocation2 + $0x181] sm:$0x3] %vm409_vm1, %v400_v16  ;;  %v2613_v16 = vpack.c.bf16 %v2578_v56, %v2577_v51  ;;  %v5067_v51 = vld [vmem:[%s6843_s2 + $0x1b8] sm:$0xff]   ;;  %v5069_v56 = vld [vmem:[%s6843_s2 + $0x168] sm:$0xff]  }
 0x101   : > { %4545 = vmatprep.mubr.bf16.mxu0 %v5985_v61 }
 0x102   : > { %v641_v35 = vpop.permute.xlu1 %640  ;;  %v561_v28 = vpop.permute.xlu0 %560 }
 0x103   : > { %v1013_v38 = vld [vmem:[#allocation2 + $0x140] sm:$0xff]  ;;  %v1015_v39 = vld [vmem:[#allocation2 + $0x158] sm:$0xff]  ;;  %664 = vst.msk [vmem:[#allocation2 + $0x16f] sm:$0x3] %vm409_vm1, %v641_v35  ;;  %665 = vst.msk [vmem:[#allocation2 + $0x187] sm:$0x3] %vm409_vm1, %v641_v35 }
 0x104   : > { %v1776_v41 = vld [vmem:[#allocation2 + $0x141] sm:$0xff]  ;;  %584 = vst.msk [vmem:[#allocation2 + $0x16d] sm:$0x3] %vm409_vm1, %v561_v28  ;;  %585 = vst.msk [vmem:[#allocation2 + $0x185] sm:$0x3] %vm409_vm1, %v561_v28  ;;  %v5997_v43 = vpack.c.bf16 %v1013_v38, %v1012_v23  ;;  %v5999_v29 = vpack.c.bf16 %v1015_v39, %v1014_v26  ;;  %v1778_v45 = vld [vmem:[#allocation2 + $0x159] sm:$0xff] }
 0x105   : > { %v6001_v44 = vpack.c.bf16 %v1776_v41, %v1775_v27  ;;  %v6004_v9 = vpack.c.bf16 %v1778_v45, %v1777_v7  ;;  %v5057_v23 = vld [vmem:[%s6843_s2 + $0x188] sm:$0xff]   ;;  %v5058_v27 = vld [vmem:[%s6843_s2 + $0x190] sm:$0xff]   ;;  %v2582_v35 = vld [vmem:[#allocation2 + $0x3a] sm:$0xff] }
 0x106   : > { %4309 = vmatprep.mubr.bf16.mxu1 %v5997_v43  ;;  %v801_v6 = vpop.permute.xlu1 %800  ;;  %v721_v8 = vpop.permute.xlu0 %720  ;;  %v2580_v26 = vld [vmem:[#allocation2 + $0x22] sm:$0xff]  ;;  %v2579_v28 = vld [vmem:[#allocation2 + $0x1a] sm:$0xff]  ;;  %v2581_v39 = vld [vmem:[#allocation2 + $0x32] sm:$0xff] }
 0x107   : > { %4310 = vmatmul.mubr.bf16.gmra.mrb[24].mxu1 %v5999_v29  ;;  %824 = vst.msk [vmem:[#allocation2 + $0x173] sm:$0x3] %vm409_vm1, %v801_v6  ;;  %825 = vst.msk [vmem:[#allocation2 + $0x18b] sm:$0x3] %vm409_vm1, %v801_v6  ;;  %v6041_v38 = vpack.c.bf16 %v2580_v26, %v2579_v28  ;;  %v6043_v41 = vpack.c.bf16 %v2582_v35, %v2581_v39  ;;  %v2584_v45 = vld [vmem:[#allocation2 + $0x52] sm:$0xff]  ;;  %v5060_v7 = vld [vmem:[%s6843_s2 + $0x1a0] sm:$0xff]  }
 0x108   : > { %4546 = vmatmul.mubr.bf16.gmra.mrb[20].mxu0 %v6001_v44  ;;  %744 = vst.msk [vmem:[#allocation2 + $0x171] sm:$0x3] %vm409_vm1, %v721_v8  ;;  %745 = vst.msk [vmem:[#allocation2 + $0x189] sm:$0x3] %vm409_vm1, %v721_v8  ;;  %v2586_v6 = vld [vmem:[#allocation2 + $0x6a] sm:$0xff]  ;;  %v2593_v28 = vld [vmem:[#allocation2 + $0xc2] sm:$0xff] }
 0x109   : > { %4549 = vmatprep.mubr.bf16.mxu0 %v6004_v9  ;;  %v5065_v8 = vld [vmem:[%s6843_s2 + $0x150] sm:$0xff]  }
 0x10a   : > { %v961_v17 = vpop.permute.xlu1 %960  ;;  %v881_v18 = vpop.permute.xlu0 %880  ;;  %v5071_v26 = vld [vmem:[%s6843_s2 + $0x170] sm:$0xff]  }
 0x10b   : > { %984 = vst.msk [vmem:[#allocation2 + $0x177] sm:$0x3] %vm409_vm1, %v961_v17  ;;  %985 = vst.msk [vmem:[#allocation2 + $0x18f] sm:$0x3] %vm409_vm1, %v961_v17  ;;  %v1016_v36 = vld [vmem:[#allocation2 + $0x168] sm:$0xff]  ;;  %v1018_v49 = vld [vmem:[#allocation2 + $0x180] sm:$0xff] }
 0x10c   : > { %904 = vst.msk [vmem:[#allocation2 + $0x175] sm:$0x3] %vm409_vm1, %v881_v18  ;;  %905 = vst.msk [vmem:[#allocation2 + $0x18d] sm:$0x3] %vm409_vm1, %v881_v18  ;;  %v1779_v48 = vld [vmem:[#allocation2 + $0x169] sm:$0xff]  ;;  %v1781_v5 = vld [vmem:[#allocation2 + $0x181] sm:$0xff] }
 0x10d   : > { %v2583_v17 = vld [vmem:[#allocation2 + $0x4a] sm:$0xff] }
 0x10e   : > { %v6062_v18 = vpack.c.bf16 %v2584_v45, %v2583_v17  ;;  %v2598_v45 = vld [vmem:[#allocation2 + $0xfa] sm:$0xff]  ;;  %v2597_v17 = vld [vmem:[#allocation2 + $0xf2] sm:$0xff] }
 0x113   : > { %v1017_v50 = vld [vmem:[#allocation2 + $0x170] sm:$0xff]  ;;  %v1019_v54 = vld [vmem:[#allocation2 + $0x188] sm:$0xff] }
 0x114   : > { %v1780_v53 = vld [vmem:[#allocation2 + $0x171] sm:$0xff]  ;;  %v6017_v59 = vpack.c.bf16 %v1017_v50, %v1016_v36  ;;  %v6021_v4 = vpack.c.bf16 %v1019_v54, %v1018_v49  ;;  %v1782_v12 = vld [vmem:[#allocation2 + $0x189] sm:$0xff]  ;;  %v2590_v54 = vld [vmem:[#allocation2 + $0x9a] sm:$0xff] }
 0x115   : > { %v6019_v1 = vpack.c.bf16 %v1780_v53, %v1779_v48  ;;  %v6025_v32 = vpack.c.bf16 %v1782_v12, %v1781_v5  ;;  %v2585_v36 = vld [vmem:[#allocation2 + $0x62] sm:$0xff]  ;;  %v5064_v53 = vld [vmem:[%s6843_s2 + $0x1b0] sm:$0xff]   ;;  %v2587_v12 = vld [vmem:[#allocation2 + $0x7a] sm:$0xff]  ;;  %v6084_v42 = vpack.c.bf16 %v2590_v54, %v2589_v33 }
 0x116   : > { %4313 = vmatprep.mubr.bf16.mxu1 %v6017_v59  ;;  %v6064_v48 = vpack.c.bf16 %v2586_v6, %v2585_v36  ;;  %v5062_v49 = vld [vmem:[%s6843_s2 + $0x1a8] sm:$0xff]   ;;  %v5068_v5 = vld [vmem:[%s6843_s2 + $0x160] sm:$0xff]   ;;  %v6118_v36 = vpack.c.bf16 %v2598_v45, %v2597_v17 }
 0x117   : > { %4550 = vmatmul.mubr.bf16.gmra.mrb[24].mxu0 %v6019_v1  ;;  %4314 = vmatmul.mubr.bf16.gmra.mrb[28].mxu1 %v6021_v4  ;;  %v2588_v50 = vld [vmem:[#allocation2 + $0x82] sm:$0xff]  ;;  %v2595_v6 = vld [vmem:[#allocation2 + $0xda] sm:$0xff] }
 0x118   : > { %4553 = vmatprep.mubr.bf16.mxu0 %v6025_v32  ;;  %4333 = vmatprep.mubr.bf16.mxu1 %v6023_v22  ;;  %v6082_v13 = vpack.c.bf16 %v2588_v50, %v2587_v12  ;;  %v2599_v50 = vld [vmem:[#allocation2 + $0x10a] sm:$0xff]  ;;  %v2601_v54 = vld [vmem:[#allocation2 + $0x122] sm:$0xff]  ;;  %v2606_v33 = vld [vmem:[#allocation2 + $0x15a] sm:$0xff] }
 0x119   : > { %v2604_v12 = vld [vmem:[#allocation2 + $0x142] sm:$0xff] }
 0x11a   : > { %v5084_v45 = vld [vmem:[%s6843_s2 + $0x220] sm:$0xff]  }
 0x11f   : > { %4554 = vmatmul.mubr.bf16.gmra.mrb[28].mxu0 %v1802_v62  ;;  %4334 = vmatmul.mubr.bf16.vlgmr.msra.gmra.mrb[0].mxu1 %v5738_v55  ;;  %v5059_v55 = vld [vmem:[%s6843_s2 + $0x198] sm:$0xff]  }
 0x120   : > { %4573 = vmatprep.mubr.bf16.mxu0 %v2613_v16  ;;  %4366 = vmatpush3.bf16.msra.mxu1 %v5842_v47  ;;  %v5063_v47 = vld [vmem:[%s6843_s2 + $0x148] sm:$0xff]   ;;  %v2592_v62 = vld [vmem:[#allocation2 + $0xb2] sm:$0xff]  ;;  %v5070_v16 = vld [vmem:[%s6843_s2 + $0x40] sm:$0xff]  }
 0x121   : > { %4337 = vmatprep.mubr.bf16.mxu1 %v5742_v58  ;;  %4367 = vmatprep.subr.bf16.mxu1 %v5057_v23 }
 0x124   : > { %4368 = vmatpush3.bf16.msra.mxu1 %v5057_v23  ;;  %v2594_v23 = vld [vmem:[#allocation2 + $0xca] sm:$0xff] }
 0x125   : > { %4369 = vmatprep.subr.bf16.mxu1 %v5058_v27  ;;  %v6104_v39 = vpack.c.bf16 %v2594_v23, %v2593_v28 }
 0x127   : > { %4574 = vmatmul.mubr.bf16.vlgmr.msra.gmra.mrb[0].mxu0 %v6041_v38  ;;  %4338 = vmatmul.mubr.bf16.gmra.mrb[4].mxu1 %v5792_v2 }
 0x128   : > { %4577 = vmatprep.mubr.bf16.mxu0 %v6043_v41  ;;  %4341 = vmatprep.mubr.bf16.mxu1 %v5796_v15 }
 0x129   : > { %4370 = vmatpush3.bf16.msra.mxu1 %v5058_v27  ;;  %4606 = vmatpush3.bf16.msra.mxu0 %v5976_v14  ;;  %v5066_v14 = vld [vmem:[%s6843_s2 + $0x158] sm:$0xff]   ;;  %v2591_v27 = vld [vmem:[#allocation2 + $0xaa] sm:$0xff] }
 0x12a   : > { %4371 = vmatprep.subr.bf16.mxu1 %v5059_v55  ;;  %4607 = vmatprep.subr.bf16.mxu0 %v5063_v47  ;;  %v6102_v35 = vpack.c.bf16 %v2592_v62, %v2591_v27  ;;  %v2605_v62 = vld [vmem:[#allocation2 + $0x152] sm:$0xff]  ;;  %v2607_v27 = vld [vmem:[#allocation2 + $0x16a] sm:$0xff] }
 0x12b   : > { %v6134_v23 = vpack.c.bf16 %v2606_v33, %v2605_v62 }
 0x12d   : > { %4372 = vmatpush3.bf16.msra.mxu1 %v5059_v55  ;;  %4608 = vmatpush3.bf16.msra.mxu0 %v5063_v47  ;;  %v5072_v55 = vld [vmem:[%s6843_s2 + $0x178] sm:$0xff]   ;;  %v2596_v47 = vld [vmem:[#allocation2 + $0xe2] sm:$0xff] }
 0x12e   : > { %4373 = vmatprep.subr.bf16.mxu1 %v5060_v7  ;;  %4609 = vmatprep.subr.bf16.mxu0 %v5065_v8 }
 0x12f   : > { %4578 = vmatmul.mubr.bf16.gmra.mrb[4].mxu0 %v6062_v18  ;;  %4342 = vmatmul.mubr.bf16.gmra.mrb[8].mxu1 %v5848_v19 }
 0x130   : > { %4581 = vmatprep.mubr.bf16.mxu0 %v6064_v48  ;;  %4345 = vmatprep.mubr.bf16.mxu1 %v5852_v46 }
 0x131   : > { %4374 = vmatpush3.bf16.msra.mxu1 %v5060_v7  ;;  %4610 = vmatpush3.bf16.msra.mxu0 %v5065_v8  ;;  %v5077_v7 = vld [vmem:[%s6843_s2 + $0x200] sm:$0xff]   ;;  %v6116_v8 = vpack.c.bf16 %v2596_v47, %v2595_v6  ;;  %v5075_v47 = vld [vmem:[%s6843_s2 + $0x58] sm:$0xff]  }
 0x132   : > { %4375 = vmatprep.subr.bf16.mxu1 %v5062_v49  ;;  %4611 = vmatprep.subr.bf16.mxu0 %v5066_v14  ;;  %v5091_v6 = vld [vmem:[%s6843_s2 + $0x100] sm:$0xff]  }
 0x135   : > { %4376 = vmatpush3.bf16.msra.mxu1 %v5062_v49  ;;  %4612 = vmatpush3.bf16.msra.mxu0 %v5066_v14  ;;  %v2600_v49 = vld [vmem:[#allocation2 + $0x112] sm:$0xff]  ;;  %v2602_v14 = vld [vmem:[#allocation2 + $0x12a] sm:$0xff] }
 0x136   : > { %4377 = vmatprep.subr.bf16.mxu1 %v5064_v53  ;;  %4613 = vmatprep.subr.bf16.mxu0 %v5068_v5 }
 0x137   : > { %4582 = vmatmul.mubr.bf16.gmra.mrb[8].mxu0 %v6082_v13  ;;  %4346 = vmatmul.mubr.bf16.gmra.mrb[12].mxu1 %v5878_v20 }
 0x138   : > { %4585 = vmatprep.mubr.bf16.mxu0 %v6084_v42  ;;  %4349 = vmatprep.mubr.bf16.mxu1 %v5882_v31 }
 0x139   : > { %4378 = vmatpush3.bf16.msra.mxu1 %v5064_v53  ;;  %4614 = vmatpush3.bf16.msra.mxu0 %v5068_v5  ;;  %v6124_v53 = vpack.c.bf16 %v2600_v49, %v2599_v50  ;;  %v6126_v5 = vpack.c.bf16 %v2602_v14, %v2601_v54 }
 0x13a   : > { %4379 = vmatprep.subr.bf16.mxu1 %v5067_v51  ;;  %4615 = vmatprep.subr.bf16.mxu0 %v5069_v56 }
 0x13d   : > { %4380 = vmatpush3.bf16.msra.mxu1 %v5067_v51  ;;  %4616 = vmatpush3.bf16.msra.mxu0 %v5069_v56  ;;  %v2603_v51 = vld [vmem:[#allocation2 + $0x13a] sm:$0xff] }
 0x13e   : > { %4413 = vmatprep.subr.bf16.mxu1 %v5070_v16  ;;  %4617 = vmatprep.subr.bf16.mxu0 %v5071_v26  ;;  %v6132_v56 = vpack.c.bf16 %v2604_v12, %v2603_v51 }
 0x13f   : > { %4586 = vmatmul.mubr.bf16.gmra.mrb[12].mxu0 %v6102_v35  ;;  %4350 = vmatmul.mubr.bf16.gmra.mrb[16].mxu1 %v5916_v21 }
 0x140   : > { %4589 = vmatprep.mubr.bf16.mxu0 %v6104_v39  ;;  %4353 = vmatprep.mubr.bf16.mxu1 %v5918_v40 }
 0x141   : > { %4618 = vmatpush3.bf16.msra.mxu0 %v5071_v26  ;;  %v2608_v26 = vld [vmem:[#allocation2 + $0x172] sm:$0xff] }
 0x142   : > { %4619 = vmatprep.subr.bf16.mxu0 %v5072_v55  ;;  %v6140_v28 = vpack.c.bf16 %v2608_v26, %v2607_v27 }
 0x145   : > { %4620 = vmatpush3.bf16.msra.mxu0 %v5072_v55  ;;  %v5073_v55 = vld [vmem:[%s6843_s2 + $0x48] sm:$0xff]  }
 0x146   : > { %4653 = vmatprep.subr.bf16.mxu0 %v5077_v7 }
 0x147   : > { %4590 = vmatmul.mubr.bf16.gmra.mrb[16].mxu0 %v6116_v8  ;;  %4354 = vmatmul.mubr.bf16.gmra.mrb[20].mxu1 %v5954_v60 }
 0x148   : > { %4593 = vmatprep.mubr.bf16.mxu0 %v6118_v36  ;;  %4357 = vmatprep.mubr.bf16.mxu1 %v5956_v0 }
 0x14f   : > { %4594 = vmatmul.mubr.bf16.gmra.mrb[20].mxu0 %v6124_v53  ;;  %4358 = vmatmul.mubr.bf16.gmra.mrb[24].mxu1 %v5997_v43 }
 0x150   : > { %4597 = vmatprep.mubr.bf16.mxu0 %v6126_v5  ;;  %4361 = vmatprep.mubr.bf16.mxu1 %v5999_v29 }
 0x157   : > { %4598 = vmatmul.mubr.bf16.gmra.mrb[24].mxu0 %v6132_v56  ;;  %4362 = vmatmul.mubr.bf16.gmra.mrb[28].mxu1 %v6017_v59 }
 0x158   : > { %4601 = vmatprep.mubr.bf16.mxu0 %v6134_v23  ;;  %4381 = vmatprep.mubr.bf16.mxu1 %v5742_v58  ;;  %v5074_v58 = vld [vmem:[%s6843_s2 + $0x50] sm:$0xff]  }
 0x15f   : > { %4602 = vmatmul.mubr.bf16.gmra.mrb[28].mxu0 %v6140_v28  ;;  %4382 = vmatmul.mubr.bf16.vlgmr.msra.gmra.mrb[0].mxu1 %v5792_v2  ;;  %v5079_v2 = vld [vmem:[%s6843_s2 + $0x208] sm:$0xff]  }
 0x160   : > { %4621 = vmatprep.mubr.bf16.mxu0 %v6041_v38  ;;  %4414 = vmatpush3.bf16.msra.mxu1 %v5070_v16  ;;  %v5081_v38 = vld [vmem:[%s6843_s2 + $0x210] sm:$0xff]  }
 0x161   : > { %4385 = vmatprep.mubr.bf16.mxu1 %v5796_v15  ;;  %4415 = vmatprep.subr.bf16.mxu1 %v5073_v55  ;;  %v5076_v15 = vld [vmem:[%s6843_s2 + $0x60] sm:$0xff]   ;;  %v5080_v16 = vld [vmem:[%s6843_s2 + $0x70] sm:$0xff]  }
 0x164   : > { %4416 = vmatpush3.bf16.msra.mxu1 %v5073_v55 }
 0x165   : > { %4417 = vmatprep.subr.bf16.mxu1 %v5074_v58 }
 0x167   : > { %4622 = vmatmul.mubr.bf16.vlgmr.msra.gmra.mrb[0].mxu0 %v6043_v41  ;;  %4386 = vmatmul.mubr.bf16.gmra.mrb[4].mxu1 %v5848_v19  ;;  %v5078_v19 = vld [vmem:[%s6843_s2 + $0x68] sm:$0xff]  }
 0x168   : > { %4625 = vmatprep.mubr.bf16.mxu0 %v6062_v18  ;;  %4389 = vmatprep.mubr.bf16.mxu1 %v5852_v46  ;;  %v5082_v46 = vld [vmem:[%s6843_s2 + $0x218] sm:$0xff]  }
 0x169   : > { %4418 = vmatpush3.bf16.msra.mxu1 %v5074_v58  ;;  %4654 = vmatpush3.bf16.msra.mxu0 %v5077_v7  ;;  %v5086_v7 = vld [vmem:[%s6843_s2 + $0x230] sm:$0xff]  }
 0x16a   : > { %4419 = vmatprep.subr.bf16.mxu1 %v5075_v47  ;;  %4655 = vmatprep.subr.bf16.mxu0 %v5079_v2 }
 0x16d   : > { %4420 = vmatpush3.bf16.msra.mxu1 %v5075_v47  ;;  %4656 = vmatpush3.bf16.msra.mxu0 %v5079_v2 }
 0x16e   : > { %4421 = vmatprep.subr.bf16.mxu1 %v5076_v15  ;;  %4657 = vmatprep.subr.bf16.mxu0 %v5081_v38 }
 0x16f   : > { %4626 = vmatmul.mubr.bf16.gmra.mrb[4].mxu0 %v6064_v48  ;;  %4390 = vmatmul.mubr.bf16.gmra.mrb[8].mxu1 %v5878_v20  ;;  %v5083_v20 = vld [vmem:[%s6843_s2 + $0x78] sm:$0xff]  }
 0x170   : > { %4629 = vmatprep.mubr.bf16.mxu0 %v6082_v13  ;;  %4393 = vmatprep.mubr.bf16.mxu1 %v5882_v31  ;;  %v5085_v31 = vld [vmem:[%s6843_s2 + $0x228] sm:$0xff]  }
 0x171   : > { %4422 = vmatpush3.bf16.msra.mxu1 %v5076_v15  ;;  %4658 = vmatpush3.bf16.msra.mxu0 %v5081_v38 }
 0x172   : > { %4423 = vmatprep.subr.bf16.mxu1 %v5078_v19  ;;  %4659 = vmatprep.subr.bf16.mxu0 %v5082_v46 }
 0x175   : > { %4424 = vmatpush3.bf16.msra.mxu1 %v5078_v19  ;;  %4660 = vmatpush3.bf16.msra.mxu0 %v5082_v46 }
 0x176   : > { %4425 = vmatprep.subr.bf16.mxu1 %v5080_v16  ;;  %4661 = vmatprep.subr.bf16.mxu0 %v5084_v45 }
 0x177   : > { %4630 = vmatmul.mubr.bf16.gmra.mrb[8].mxu0 %v6084_v42  ;;  %4394 = vmatmul.mubr.bf16.gmra.mrb[12].mxu1 %v5916_v21  ;;  %v5087_v21 = vld [vmem:[%s6843_s2 + $0x238] sm:$0xff]  }
 0x178   : > { %4633 = vmatprep.mubr.bf16.mxu0 %v6102_v35  ;;  %4397 = vmatprep.mubr.bf16.mxu1 %v5918_v40  ;;  %v1749_v40 = vld [vmem:[#allocation2 + $0x1] sm:$0xff] }
 0x179   : > { %4426 = vmatpush3.bf16.msra.mxu1 %v5080_v16  ;;  %4662 = vmatpush3.bf16.msra.mxu0 %v5084_v45 }
 0x17a   : > { %4427 = vmatprep.subr.bf16.mxu1 %v5083_v20  ;;  %4663 = vmatprep.subr.bf16.mxu0 %v5085_v31 }
 0x17d   : > { %4428 = vmatpush3.bf16.msra.mxu1 %v5083_v20  ;;  %4664 = vmatpush3.bf16.msra.mxu0 %v5085_v31 }
 0x17e   : > { %4701 = vmatprep.subr.bf16.mxu1 %v5091_v6  ;;  %4665 = vmatprep.subr.bf16.mxu0 %v5086_v7 }
 0x17f   : > { %4634 = vmatmul.mubr.bf16.gmra.mrb[12].mxu0 %v6104_v39  ;;  %4398 = vmatmul.mubr.bf16.gmra.mrb[16].mxu1 %v5954_v60  ;;  %v1750_v60 = vld [vmem:[#allocation2 + $0x9] sm:$0xff] }
 0x180   : > { %4637 = vmatprep.mubr.bf16.mxu0 %v6116_v8  ;;  %4401 = vmatprep.mubr.bf16.mxu1 %v5956_v0  ;;  %v1785_v0 = vpack.c.bf16 %v1750_v60, %v1749_v40 }
 0x181   : > { %4666 = vmatpush3.bf16.msra.mxu0 %v5086_v7 }
 0x182   : > { %4667 = vmatprep.subr.bf16.mxu0 %v5087_v21 }
 0x185   : > { %4668 = vmatpush3.bf16.msra.mxu0 %v5087_v21 }
 0x187   : > { %4638 = vmatmul.mubr.bf16.gmra.mrb[16].mxu0 %v6118_v36  ;;  %4402 = vmatmul.mubr.bf16.gmra.mrb[20].mxu1 %v5997_v43  ;;  %v2610_v43 = vld [vmem:[#allocation2 + $0x18a] sm:$0xff] }
 0x188   : > { %4641 = vmatprep.mubr.bf16.mxu0 %v6124_v53  ;;  %4405 = vmatprep.mubr.bf16.mxu1 %v5999_v29  ;;  %v2609_v29 = vld [vmem:[#allocation2 + $0x182] sm:$0xff] }
 0x189   : > { %v2629_v17 = vpack.c.bf16 %v2610_v43, %v2609_v29 }
 0x18f   : > { %4642 = vmatmul.mubr.bf16.gmra.mrb[20].mxu0 %v6126_v5  ;;  %4406 = vmatmul.mubr.bf16.gmra.mrb[24].mxu1 %v6017_v59  ;;  %v5092_v59 = vld [vmem:[%s6843_s2 + $0x108] sm:$0xff]  }
 0x190   : > { %4645 = vmatprep.mubr.bf16.mxu0 %v6132_v56  ;;  %4409 = vmatprep.mubr.bf16.mxu1 %v6021_v4  ;;  %v5093_v4 = vld [vmem:[%s6843_s2 + $0x110] sm:$0xff]  }
 0x197   : > { %4646 = vmatmul.mubr.bf16.gmra.mrb[24].mxu0 %v6134_v23  ;;  %4410 = vmatmul.mubr.bf16.gmra.mrb[28].mxu1 %v6023_v22 }
 0x198   : > { %4649 = vmatprep.mubr.bf16.mxu0 %v6140_v28  ;;  %4429 = vmatprep.mubr.bf16.mxu1 %v1785_v0 }
 0x19f   : > { %4650 = vmatmul.mubr.bf16.gmra.mrb[28].mxu0 %v2629_v17  ;;  %4430 = vmatmul.mubr.bf16.vlgmr.msra.gmra.mrb[0].mxu1 %v5740_v57  ;;  %v5094_v57 = vld [vmem:[%s6843_s2 + $0x118] sm:$0xff]  }
 0x1a0   : > { %4669 = vmatprep.mubr.bf16.mxu0 %v6043_v41  ;;  %4709 = vmatpush3.bf16.msra.mxu1 %v5091_v6 }
 0x1a1   : > { %4433 = vmatprep.mubr.bf16.mxu1 %v5744_v63  ;;  %4702 = vmatprep.subr.bf16.mxu1 %v5092_v59  ;;  %v5095_v63 = vld [vmem:[%s6843_s2 + $0x120] sm:$0xff]  }
 0x1a4   : > { %4710 = vmatpush3.bf16.msra.mxu1 %v5092_v59 }
 0x1a5   : > { %4703 = vmatprep.subr.bf16.mxu1 %v5093_v4 }
 0x1a7   : > { %4670 = vmatmul.mubr.bf16.vlgmr.msra.gmra.mrb[0].mxu0 %v6062_v18  ;;  %4434 = vmatmul.mubr.bf16.gmra.mrb[4].mxu1 %v5794_v11  ;;  %v5096_v11 = vld [vmem:[%s6843_s2 + $0x128] sm:$0xff]  }
 0x1a8   : > { %4673 = vmatprep.mubr.bf16.mxu0 %v6064_v48  ;;  %4437 = vmatprep.mubr.bf16.mxu1 %v5798_v25  ;;  %v5097_v25 = vld [vmem:[%s6843_s2 + $0x130] sm:$0xff]  }
 0x1a9   : > { %4711 = vmatpush3.bf16.msra.mxu1 %v5093_v4 }
 0x1aa   : > { %4704 = vmatprep.subr.bf16.mxu1 %v5094_v57 }
 0x1ad   : > { %4712 = vmatpush3.bf16.msra.mxu1 %v5094_v57 }
 0x1ae   : > { %4705 = vmatprep.subr.bf16.mxu1 %v5095_v63 }
 0x1af   : > { %4674 = vmatmul.mubr.bf16.gmra.mrb[4].mxu0 %v6082_v13  ;;  %4438 = vmatmul.mubr.bf16.gmra.mrb[8].mxu1 %v5850_v24  ;;  %v5098_v24 = vld [vmem:[%s6843_s2 + $0x138] sm:$0xff]  }
 0x1b0   : > { %4677 = vmatprep.mubr.bf16.mxu0 %v6084_v42  ;;  %4441 = vmatprep.mubr.bf16.mxu1 %v5854_v52  ;;  %v2611_v52 = vld [vmem:[#allocation2 + $0x19a] sm:$0xff] }
 0x1b1   : > { %4713 = vmatpush3.bf16.msra.mxu1 %v5095_v63 }
 0x1b2   : > { %4706 = vmatprep.subr.bf16.mxu1 %v5096_v11 }
 0x1b5   : > { %4714 = vmatpush3.bf16.msra.mxu1 %v5096_v11 }
 0x1b6   : > { %4707 = vmatprep.subr.bf16.mxu1 %v5097_v25 }
 0x1b7   : > { %4678 = vmatmul.mubr.bf16.gmra.mrb[8].mxu0 %v6102_v35  ;;  %4442 = vmatmul.mubr.bf16.gmra.mrb[12].mxu1 %v5880_v30  ;;  %v2612_v30 = vld [vmem:[#allocation2 + $0x1a2] sm:$0xff] }
 0x1b8   : > { %4681 = vmatprep.mubr.bf16.mxu0 %v6104_v39  ;;  %4445 = vmatprep.mubr.bf16.mxu1 %v5884_v34  ;;  %v2630_v34 = vpack.c.bf16 %v2612_v30, %v2611_v52 }
 0x1b9   : > { %4715 = vmatpush3.bf16.msra.mxu1 %v5097_v25 }
 0x1ba   : > { %4708 = vmatprep.subr.bf16.mxu1 %v5098_v24 }
 0x1bd   : > { %4716 = vmatpush3.bf16.msra.mxu1 %v5098_v24 }
 0x1bf   : > { %4682 = vmatmul.mubr.bf16.gmra.mrb[12].mxu0 %v6116_v8  ;;  %4446 = vmatmul.mubr.bf16.gmra.mrb[16].mxu1 %v5958_v3 }
 0x1c0   : > { %4685 = vmatprep.mubr.bf16.mxu0 %v6118_v36  ;;  %4449 = vmatprep.mubr.bf16.mxu1 %v5964_v10 }
 0x1c7   : > { %4686 = vmatmul.mubr.bf16.gmra.mrb[16].mxu0 %v6124_v53  ;;  %4450 = vmatmul.mubr.bf16.gmra.mrb[20].mxu1 %v5982_v37 }
 0x1c8   : > { %4689 = vmatprep.mubr.bf16.mxu0 %v6126_v5  ;;  %4453 = vmatprep.mubr.bf16.mxu1 %v5985_v61 }
 0x1cf   : > { %4690 = vmatmul.mubr.bf16.gmra.mrb[20].mxu0 %v6132_v56  ;;  %4454 = vmatmul.mubr.bf16.gmra.mrb[24].mxu1 %v6001_v44 }
 0x1d0   : > { %4693 = vmatprep.mubr.bf16.mxu0 %v6134_v23  ;;  %4457 = vmatprep.mubr.bf16.mxu1 %v6004_v9 }
 0x1d7   : > { %4694 = vmatmul.mubr.bf16.gmra.mrb[24].mxu0 %v6140_v28  ;;  %4458 = vmatmul.mubr.bf16.gmra.mrb[28].mxu1 %v6019_v1 }
 0x1d8   : > { %4697 = vmatprep.mubr.bf16.mxu0 %v2629_v17  ;;  %4493 = vmatprep.mubr.bf16.mxu1 %v5958_v3 }
 0x1df   : > { %4698 = vmatmul.mubr.bf16.gmra.mrb[28].mxu0 %v2630_v34  ;;  %4494 = vmatmul.mubr.bf16.vlgmr.msra.gmra.mrb[16].mxu1 %v5964_v10 }
 0x1e0   : > { %4497 = vmatprep.mubr.bf16.mxu1 %v5982_v37 }
 0x1e7   : > { %4498 = vmatmul.mubr.bf16.gmra.mrb[20].mxu1 %v5985_v61  ;;  %v6279_v61 = vld [vmem:[%s6844_s3] ss:$0 sm:$0xff] }
 0x1e8   : > { %4501 = vmatprep.mubr.bf16.mxu1 %v6001_v44 }
 0x1ef   : > { %4502 = vmatmul.mubr.bf16.gmra.mrb[24].mxu1 %v6004_v9 }
 0x1f0   : > { %4505 = vmatprep.mubr.bf16.mxu1 %v6019_v1 }
 0x1f7   : > { %4506 = vmatmul.mubr.bf16.gmra.mrb[28].mxu1 %v6025_v32 }
 0x272   : > { %v4431_v22 = vpop.f32.mrb[0].mxu1 }
 0x273   : > { %v1902_v41 = vpop.f32.mrb[1].mxu1 }
 0x274   : > { %v4432_v18 = vpop.f32.mrb[2].mxu1 }
 0x275   : > { %v1905_v3 = vpop.f32.mrb[3].mxu1 }
 0x27a   : > { %v4671_v48 = vpop.f32.mrb[0].mxu0  ;;  %v4435_v42 = vpop.f32.mrb[4].mxu1 }
 0x27b   : > { %v4717_v13 = vadd.f32 %v4671_v48, %v4431_v22  ;;  %v3246_v10 = vpop.f32.mrb[1].mxu0  ;;  %v1918_v37 = vpop.f32.mrb[5].mxu1 }
 0x27c   : > { %v4718_v35 = vadd.f32 %v3246_v10, %v1902_v41  ;;  %v4672_v39 = vpop.f32.mrb[2].mxu0  ;;  %v4436_v9 = vpop.f32.mrb[6].mxu1 }
 0x27d   : > { %v4719_v44 = vadd.f32 %v4672_v39, %v4432_v18  ;;  %v3249_v1 = vpop.f32.mrb[3].mxu0  ;;  %v1921_v8 = vpop.f32.mrb[7].mxu1  ;;  %v6288_v14 = vadd.f32 %v4717_v13, %v6279_v61 }
 0x27e   : > { %v4720_v32 = vadd.f32 %v3249_v1, %v1905_v3  ;;  %v6282_v36 = vadd.f32 %v4718_v35, %v6279_v61 }
 0x27f   : > { %v6294_v23 = vadd.f32 %v4719_v44, %v6279_v61 }
 0x280   : > { %v6285_v49 = vadd.f32 %v4720_v32, %v6279_v61 }
 0x282   : > { %v3444_v50 = vadd.f32 %v6285_v49, %v6282_v36  ;;  %v4675_v53 = vpop.f32.mrb[4].mxu0  ;;  %v4439_v5 = vpop.f32.mrb[8].mxu1 }
 0x283   : > { %v4721_v54 = vadd.f32 %v4675_v53, %v4435_v42  ;;  %v3262_v12 = vpop.f32.mrb[5].mxu0  ;;  %v1934_v56 = vpop.f32.mrb[9].mxu1 }
 0x284   : > { %v3445_v33 = vadd.f32 %v3444_v50, %v6288_v14  ;;  %v4722_v51 = vadd.f32 %v3262_v12, %v1918_v37  ;;  %v4676_v62 = vpop.f32.mrb[6].mxu0  ;;  %v4440_v27 = vpop.f32.mrb[10].mxu1 }
 0x285   : > { %v4723_v26 = vadd.f32 %v4676_v62, %v4436_v9  ;;  %v3265_v28 = vpop.f32.mrb[7].mxu0  ;;  %v1937_v58 = vpop.f32.mrb[11].mxu1  ;;  %v6306_v29 = vadd.f32 %v4721_v54, %v6279_v61 }
 0x286   : > { %v4724_v55 = vadd.f32 %v3265_v28, %v1921_v8  ;;  %v6297_v47 = vadd.f32 %v4722_v51, %v6279_v61  ;;  %v3446_v2 = vadd.f32 %v3445_v33, %v6294_v23 }
 0x287   : > { %v6310_v25 = vadd.f32 %v4723_v26, %v6279_v61 }
 0x288   : > { %v3447_v38 = vadd.f32 %v3446_v2, %v6297_v47  ;;  %v6302_v19 = vadd.f32 %v4724_v55, %v6279_v61 }
 0x28a   : > { %v4679_v15 = vpop.f32.mrb[8].mxu0  ;;  %v4443_v16 = vpop.f32.mrb[12].mxu1  ;;  %v3448_v43 = vadd.f32 %v3447_v38, %v6302_v19 }
 0x28b   : > { %v4725_v46 = vadd.f32 %v4679_v15, %v4439_v5  ;;  %v3278_v45 = vpop.f32.mrb[9].mxu0  ;;  %v1950_v31 = vpop.f32.mrb[13].mxu1 }
 0x28c   : > { %v4726_v20 = vadd.f32 %v3278_v45, %v1934_v56  ;;  %v4680_v7 = vpop.f32.mrb[10].mxu0  ;;  %v4444_v21 = vpop.f32.mrb[14].mxu1  ;;  %v3449_v59 = vadd.f32 %v3448_v43, %v6306_v29 }
 0x28d   : > { %v4727_v6 = vadd.f32 %v4680_v7, %v4440_v27  ;;  %v3281_v40 = vpop.f32.mrb[11].mxu0  ;;  %v1953_v0 = vpop.f32.mrb[15].mxu1  ;;  %v6322_v35 = vadd.f32 %v4725_v46, %v6279_v61 }
 0x28e   : > { %v4728_v60 = vadd.f32 %v3281_v40, %v1937_v58  ;;  %v6313_v34 = vadd.f32 %v4726_v20, %v6279_v61  ;;  %v3450_v22 = vadd.f32 %v3449_v59, %v6310_v25 }
 0x28f   : > { %v6326_v1 = vadd.f32 %v4727_v6, %v6279_v61 }
 0x290   : > { %v3451_v18 = vadd.f32 %v3450_v22, %v6313_v34  ;;  %v6318_v3 = vadd.f32 %v4728_v60, %v6279_v61 }
 0x292   : > { %v4683_v17 = vpop.f32.mrb[12].mxu0  ;;  %v3452_v10 = vadd.f32 %v3451_v18, %v6318_v3 }
 0x293   : > { %v4729_v4 = vadd.f32 %v4683_v17, %v4443_v16  ;;  %v3294_v57 = vpop.f32.mrb[13].mxu0 }
 0x294   : > { %v4730_v63 = vadd.f32 %v3294_v57, %v1950_v31  ;;  %v4684_v11 = vpop.f32.mrb[14].mxu0  ;;  %v3453_v39 = vadd.f32 %v3452_v10, %v6322_v35 }
 0x295   : > { %v4731_v24 = vadd.f32 %v4684_v11, %v4444_v21  ;;  %v3297_v52 = vpop.f32.mrb[15].mxu0  ;;  %v6338_v62 = vadd.f32 %v4729_v4, %v6279_v61 }
 0x296   : > { %v4732_v30 = vadd.f32 %v3297_v52, %v1953_v0  ;;  %v6329_v8 = vadd.f32 %v4730_v63, %v6279_v61  ;;  %v3454_v50 = vadd.f32 %v3453_v39, %v6326_v1 }
 0x297   : > { %v6342_v38 = vadd.f32 %v4731_v24, %v6279_v61 }
 0x298   : > { %v3455_v54 = vadd.f32 %v3454_v50, %v6329_v8  ;;  %v6334_v5 = vadd.f32 %v4732_v30, %v6279_v61 }
 0x29a   : > { %v4687_v41 = vpop.f32.mrb[16].mxu0  ;;  %v3456_v56 = vadd.f32 %v3455_v54, %v6334_v5 }
 0x29b   : > { %v3310_v48 = vpop.f32.mrb[17].mxu0 }
 0x29c   : > { %v4688_v13 = vpop.f32.mrb[18].mxu0  ;;  %v3457_v27 = vadd.f32 %v3456_v56, %v6338_v62 }
 0x29d   : > { %v3313_v42 = vpop.f32.mrb[19].mxu0 }
 0x29e   : > { %v3458_v6 = vadd.f32 %v3457_v27, %v6342_v38 }
 0x2a2   : > { %v4691_v37 = vpop.f32.mrb[20].mxu0 }
 0x2a3   : > { %v3326_v44 = vpop.f32.mrb[21].mxu0 }
 0x2a4   : > { %v4692_v9 = vpop.f32.mrb[22].mxu0 }
 0x2a5   : > { %v3329_v32 = vpop.f32.mrb[23].mxu0 }
 0x2aa   : > { %v4695_v53 = vpop.f32.mrb[24].mxu0 }
 0x2ab   : > { %v3342_v12 = vpop.f32.mrb[25].mxu0 }
 0x2ac   : > { %v4696_v33 = vpop.f32.mrb[26].mxu0 }
 0x2ad   : > { %v3345_v51 = vpop.f32.mrb[27].mxu0 }
 0x2b2   : > { %v4699_v26 = vpop.f32.mrb[28].mxu0  ;;  %v4495_v28 = vpop.f32.mrb[16].mxu1 }
 0x2b3   : > { %v3358_v55 = vpop.f32.mrb[29].mxu0  ;;  %v4733_v58 = vadd.f32 %v4687_v41, %v4495_v28  ;;  %v2224_v2 = vpop.f32.mrb[17].mxu1 }
 0x2b4   : > { %v4700_v15 = vpop.f32.mrb[30].mxu0  ;;  %v4734_v46 = vadd.f32 %v3310_v48, %v2224_v2  ;;  %v4496_v16 = vpop.f32.mrb[18].mxu1 }
 0x2b5   : > { %v3361_v45 = vpop.f32.mrb[31].mxu0  ;;  %v4735_v20 = vadd.f32 %v4688_v13, %v4496_v16  ;;  %v2227_v31 = vpop.f32.mrb[19].mxu1  ;;  %v3430_v0 = vadd.f32 %v4733_v58, %v6279_v61 }
 0x2b6   : > { %v6345_v7 = vadd.f32 %v4734_v46, %v6279_v61  ;;  %v4736_v21 = vadd.f32 %v3313_v42, %v2227_v31 }
 0x2b7   : > { %v3431_v57 = vadd.f32 %v4735_v20, %v6279_v61 }
 0x2b8   : > { %v3459_v40 = vadd.f32 %v3458_v6, %v6345_v7  ;;  %v3429_v60 = vadd.f32 %v4736_v21, %v6279_v61 }
 0x2ba   : > { %v3460_v43 = vadd.f32 %v3459_v40, %v3429_v60  ;;  %v4499_v17 = vpop.f32.mrb[20].mxu1 }
 0x2bb   : > { %v4737_v59 = vadd.f32 %v4691_v37, %v4499_v17  ;;  %v2240_v4 = vpop.f32.mrb[21].mxu1 }
 0x2bc   : > { %v3461_v63 = vadd.f32 %v3460_v43, %v3430_v0  ;;  %v4738_v11 = vadd.f32 %v3326_v44, %v2240_v4  ;;  %v4500_v24 = vpop.f32.mrb[22].mxu1 }
 0x2bd   : > { %v4739_v52 = vadd.f32 %v4692_v9, %v4500_v24  ;;  %v2243_v30 = vpop.f32.mrb[23].mxu1  ;;  %v3434_v42 = vadd.f32 %v4737_v59, %v6279_v61 }
 0x2be   : > { %v3432_v22 = vadd.f32 %v4738_v11, %v6279_v61  ;;  %v3462_v41 = vadd.f32 %v3461_v63, %v3431_v57  ;;  %v4740_v18 = vadd.f32 %v3329_v32, %v2243_v30 }
 0x2bf   : > { %v3435_v54 = vadd.f32 %v4739_v52, %v6279_v61 }
 0x2c0   : > { %v3463_v48 = vadd.f32 %v3462_v41, %v3432_v22  ;;  %v3433_v13 = vadd.f32 %v4740_v18, %v6279_v61 }
 0x2c2   : > { %v3464_v10 = vadd.f32 %v3463_v48, %v3433_v13  ;;  %v4503_v39 = vpop.f32.mrb[24].mxu1 }
 0x2c3   : > { %v4741_v37 = vadd.f32 %v4695_v53, %v4503_v39  ;;  %v2256_v50 = vpop.f32.mrb[25].mxu1 }
 0x2c4   : > { %v3465_v56 = vadd.f32 %v3464_v10, %v3434_v42  ;;  %v4742_v44 = vadd.f32 %v3342_v12, %v2256_v50  ;;  %v4504_v27 = vpop.f32.mrb[26].mxu1 }
 0x2c5   : > { %v4743_v9 = vadd.f32 %v4696_v33, %v4504_v27  ;;  %v2259_v28 = vpop.f32.mrb[27].mxu1  ;;  %v3438_v20 = vadd.f32 %v4741_v37, %v6279_v61 }
 0x2c6   : > { %v3436_v58 = vadd.f32 %v4742_v44, %v6279_v61  ;;  %v3466_v2 = vadd.f32 %v3465_v56, %v3435_v54  ;;  %v4744_v32 = vadd.f32 %v3345_v51, %v2259_v28 }
 0x2c7   : > { %v3439_v40 = vadd.f32 %v4743_v9, %v6279_v61 }
 0x2c8   : > { %v3467_v46 = vadd.f32 %v3466_v2, %v3436_v58  ;;  %v3437_v16 = vadd.f32 %v4744_v32, %v6279_v61 }
 0x2ca   : > { %v3468_v31 = vadd.f32 %v3467_v46, %v3437_v16  ;;  %v4507_v6 = vpop.f32.mrb[28].mxu1 }
 0x2cb   : > { %v4745_v53 = vadd.f32 %v4699_v26, %v4507_v6  ;;  %v2272_v21 = vpop.f32.mrb[29].mxu1 }
 0x2cc   : > { %v3469_v43 = vadd.f32 %v3468_v31, %v3438_v20  ;;  %v4746_v12 = vadd.f32 %v3358_v55, %v2272_v21  ;;  %v4508_v17 = vpop.f32.mrb[30].mxu1 }
 0x2cd   : > { %v4747_v33 = vadd.f32 %v4700_v15, %v4508_v17  ;;  %v2275_v59 = vpop.f32.mrb[31].mxu1  ;;  %v3442_v52 = vadd.f32 %v4745_v53, %v6279_v61 }
 0x2ce   : > { %v3440_v4 = vadd.f32 %v4746_v12, %v6279_v61  ;;  %v3470_v63 = vadd.f32 %v3469_v43, %v3439_v40  ;;  %v4748_v51 = vadd.f32 %v3361_v45, %v2275_v59 }
 0x2cf   : > { %v3443_v26 = vadd.f32 %v4747_v33, %v6279_v61 }
 0x2d0   : > { %v3471_v11 = vadd.f32 %v3470_v63, %v3440_v4  ;;  %v3441_v24 = vadd.f32 %v4748_v51, %v6279_v61 }
 0x2d2   : > { %v3472_v30 = vadd.f32 %v3471_v11, %v3441_v24 }
 0x2d4   : > { %v3473_v41 = vadd.f32 %v3472_v30, %v3442_v52 }
 0x2d6   : > { %v3474_v18 = vadd.f32 %v3473_v41, %v3443_v26 }
 0x2d8   : > { %v3475_v48 = vrot.slane %v3474_v18, 4 }
 0x2da   : > { %v3476_v10 = vadd.f32 %v3475_v48, %v3474_v18 }
 0x2dc   : > { %v3477_v55 = vrot.slane %v3476_v10, 2 }
 0x2de   : > { %v3478_v39 = vadd.f32 %v3477_v55, %v3476_v10 }
 0x2e0   : > { %v3479_v15 = vrot.slane %v3478_v39, 1 }
 0x2e2   : > { %v3480_v37 = vadd.f32 %v3479_v15, %v3478_v39 }
 0x2e4   : > { %v3482_v50 = vmul.f32 0.00390625, %v3480_v37 }
 0x2e6   : > { %v6365_v56 = vsub.f32 %v6345_v7, %v3482_v50  ;;  %v6367_v45 = vsub.f32 %v3429_v60, %v3482_v50  ;;  %v6369_v44 = vsub.f32 %v3430_v0, %v3482_v50  ;;  %v6371_v27 = vsub.f32 %v3431_v57, %v3482_v50 }
 0x2e7   : > { %v6373_v9 = vsub.f32 %v3432_v22, %v3482_v50  ;;  %v6375_v61 = vsub.f32 %v3433_v13, %v3482_v50  ;;  %v6377_v28 = vsub.f32 %v3434_v42, %v3482_v50  ;;  %v6379_v2 = vsub.f32 %v3435_v54, %v3482_v50 }
 0x2e8   : > { %v6381_v32 = vsub.f32 %v3436_v58, %v3482_v50  ;;  %v6383_v46 = vsub.f32 %v3437_v16, %v3482_v50  ;;  %v6385_v7 = vsub.f32 %v3438_v20, %v3482_v50  ;;  %v6387_v60 = vsub.f32 %v3439_v40, %v3482_v50 }
 0x2e9   : > { %v6389_v0 = vsub.f32 %v3440_v4, %v3482_v50  ;;  %v6391_v57 = vsub.f32 %v3441_v24, %v3482_v50  ;;  %v6393_v22 = vsub.f32 %v3442_v52, %v3482_v50  ;;  %v6395_v13 = vsub.f32 %v3443_v26, %v3482_v50 }
 0x2ea   : > { %v6398_v42 = vsub.f32 %v6282_v36, %v3482_v50  ;;  %v6401_v54 = vsub.f32 %v6285_v49, %v3482_v50  ;;  %v6404_v58 = vsub.f32 %v6288_v14, %v3482_v50  ;;  %v6411_v31 = vsub.f32 %v6294_v23, %v3482_v50 }
 0x2eb   : > { %v6414_v6 = vsub.f32 %v6297_v47, %v3482_v50  ;;  %v6419_v53 = vsub.f32 %v6302_v19, %v3482_v50  ;;  %v6424_v40 = vsub.f32 %v6306_v29, %v3482_v50  ;;  %v6429_v47 = vsub.f32 %v6310_v25, %v3482_v50 }
 0x2ec   : > { %v3515_v16 = vmul.f32 %v6398_v42, %v6398_v42  ;;  %v3516_v20 = vmul.f32 %v6401_v54, %v6401_v54  ;;  %v3517_v36 = vmul.f32 %v6404_v58, %v6404_v58  ;;  %v3518_v14 = vmul.f32 %v6411_v31, %v6411_v31 }
 0x2ed   : > { %v3519_v23 = vmul.f32 %v6414_v6, %v6414_v6  ;;  %v3520_v12 = vmul.f32 %v6419_v53, %v6419_v53  ;;  %v6434_v19 = vsub.f32 %v6313_v34, %v3482_v50  ;;  %v3521_v33 = vmul.f32 %v6424_v40, %v6424_v40 }
 0x2ee   : > { %v3547_v49 = vadd.f32 %v3516_v20, %v3515_v16  ;;  %v6439_v29 = vsub.f32 %v6318_v3, %v3482_v50  ;;  %v3522_v4 = vmul.f32 %v6429_v47, %v6429_v47  ;;  %v6444_v25 = vsub.f32 %v6322_v35, %v3482_v50 }
 0x2ef   : > { %v3523_v51 = vmul.f32 %v6434_v19, %v6434_v19  ;;  %v6449_v34 = vsub.f32 %v6326_v1, %v3482_v50  ;;  %v6454_v3 = vsub.f32 %v6329_v8, %v3482_v50  ;;  %v6459_v35 = vsub.f32 %v6334_v5, %v3482_v50 }
 0x2f0   : > { %v3548_v21 = vadd.f32 %v3547_v49, %v3517_v36  ;;  %v3524_v24 = vmul.f32 %v6439_v29, %v6439_v29  ;;  %v3525_v30 = vmul.f32 %v6444_v25, %v6444_v25  ;;  %v6464_v1 = vsub.f32 %v6338_v62, %v3482_v50 }
 0x2f1   : > { %v3526_v41 = vmul.f32 %v6449_v34, %v6449_v34  ;;  %v3527_v48 = vmul.f32 %v6454_v3, %v6454_v3  ;;  %v6469_v8 = vsub.f32 %v6342_v38, %v3482_v50  ;;  %v3528_v55 = vmul.f32 %v6459_v35, %v6459_v35 }
 0x2f2   : > { %v3549_v43 = vadd.f32 %v3548_v21, %v3518_v14  ;;  %v3529_v5 = vmul.f32 %v6464_v1, %v6464_v1  ;;  %v3531_v16 = vmul.f32 %v6365_v56, %v6365_v56  ;;  %v3532_v38 = vmul.f32 %v6367_v45, %v6367_v45 }
 0x2f3   : > { %v3530_v37 = vmul.f32 %v6469_v8, %v6469_v8  ;;  %v3533_v36 = vmul.f32 %v6369_v44, %v6369_v44  ;;  %v3534_v14 = vmul.f32 %v6371_v27, %v6371_v27 }
 0x2f4   : > { %v3550_v17 = vadd.f32 %v3549_v43, %v3519_v23  ;;  %v3535_v23 = vmul.f32 %v6373_v9, %v6373_v9 }
 0x2f6   : > { %v3551_v59 = vadd.f32 %v3550_v17, %v3520_v12  ;;  %v3536_v12 = vmul.f32 %v6375_v61, %v6375_v61 }
 0x2f8   : > { %v3552_v63 = vadd.f32 %v3551_v59, %v3521_v33  ;;  %v3537_v33 = vmul.f32 %v6377_v28, %v6377_v28 }
 0x2fa   : > { %v3553_v11 = vadd.f32 %v3552_v63, %v3522_v4  ;;  %v3538_v4 = vmul.f32 %v6379_v2, %v6379_v2 }
 0x2fc   : > { %v3554_v52 = vadd.f32 %v3553_v11, %v3523_v51  ;;  %v3539_v51 = vmul.f32 %v6381_v32, %v6381_v32 }
 0x2fe   : > { %v3555_v26 = vadd.f32 %v3554_v52, %v3524_v24  ;;  %v3540_v24 = vmul.f32 %v6383_v46, %v6383_v46 }
 0x300   : > { %v3556_v18 = vadd.f32 %v3555_v26, %v3525_v30  ;;  %v3541_v30 = vmul.f32 %v6385_v7, %v6385_v7 }
 0x302   : > { %v3557_v10 = vadd.f32 %v3556_v18, %v3526_v41  ;;  %v3542_v41 = vmul.f32 %v6387_v60, %v6387_v60 }
 0x304   : > { %v3558_v39 = vadd.f32 %v3557_v10, %v3527_v48  ;;  %v3543_v48 = vmul.f32 %v6389_v0, %v6389_v0 }
 0x306   : > { %v3559_v15 = vadd.f32 %v3558_v39, %v3528_v55  ;;  %v3544_v55 = vmul.f32 %v6391_v57, %v6391_v57 }
 0x308   : > { %v3560_v62 = vadd.f32 %v3559_v15, %v3529_v5  ;;  %v3545_v5 = vmul.f32 %v6393_v22, %v6393_v22 }
 0x30a   : > { %v3561_v20 = vadd.f32 %v3560_v62, %v3530_v37  ;;  %v3546_v37 = vmul.f32 %v6395_v13, %v6395_v13 }
 0x30c   : > { %v3562_v50 = vadd.f32 %v3561_v20, %v3531_v16 }
 0x30e   : > { %v3563_v49 = vadd.f32 %v3562_v50, %v3532_v38 }
 0x310   : > { %v3564_v21 = vadd.f32 %v3563_v49, %v3533_v36 }
 0x312   : > { %v3565_v43 = vadd.f32 %v3564_v21, %v3534_v14 }
 0x314   : > { %v3566_v17 = vadd.f32 %v3565_v43, %v3535_v23 }
 0x316   : > { %v3567_v59 = vadd.f32 %v3566_v17, %v3536_v12 }
 0x318   : > { %v3568_v63 = vadd.f32 %v3567_v59, %v3537_v33 }
 0x31a   : > { %v3569_v11 = vadd.f32 %v3568_v63, %v3538_v4 }
 0x31c   : > { %v3570_v52 = vadd.f32 %v3569_v11, %v3539_v51 }
 0x31e   : > { %v3571_v26 = vadd.f32 %v3570_v52, %v3540_v24 }
 0x320   : > { %v3572_v18 = vadd.f32 %v3571_v26, %v3541_v30 }
 0x322   : > { %v3573_v10 = vadd.f32 %v3572_v18, %v3542_v41 }
 0x324   : > { %v3574_v39 = vadd.f32 %v3573_v10, %v3543_v48 }
 0x326   : > { %v3575_v15 = vadd.f32 %v3574_v39, %v3544_v55 }
 0x328   : > { %v3576_v62 = vadd.f32 %v3575_v15, %v3545_v5 }
 0x32a   : > { %v3577_v16 = vadd.f32 %v3576_v62, %v3546_v37 }
 0x32c   : > { %v3578_v20 = vrot.slane %v3577_v16, 4 }
 0x32e   : > { %v3579_v38 = vadd.f32 %v3578_v20, %v3577_v16 }
 0x330   : > { %v3580_v50 = vrot.slane %v3579_v38, 2 }
 0x332   : > { %v3581_v36 = vadd.f32 %v3580_v50, %v3579_v38 }
 0x334   : > { %v3582_v49 = vrot.slane %v3581_v36, 1 }
 0x336   : > { %v3583_v14 = vadd.f32 %v3582_v49, %v3581_v36 }
 0x338   : > { %v3584_v21 = vmul.f32 0.00390625, %v3583_v14 }
 0x33a   : > { %v3585_v23 = vadd.f32 1e-05, %v3584_v21 }
 0x33c   : > { %5088 = vrsqrt.f32 %v3585_v23 }
 0x346   : > { %v5089_v43 = vpop.eup %5088 }
 0x347   : > { %v3616_v12 = vmul.f32 %v5089_v43, %v6391_v57  ;;  %v3587_v59 = vmul.f32 %v5089_v43, %v6398_v42  ;;  %v6518_v4 = vmul.f32 %v5089_v43, %v6401_v54  ;;  %v6521_v63 = vmul.f32 %v5089_v43, %v6404_v58 }
 0x348   : > { %v6524_v51 = vmul.f32 %v5089_v43, %v6411_v31  ;;  %v6527_v57 = vmul.f32 %v5089_v43, %v6414_v6  ;;  %v6530_v11 = vmul.f32 %v5089_v43, %v6419_v53  ;;  %v6533_v24 = vmul.f32 %v5089_v43, %v6424_v40 }
 0x349   : > { %vm3648_vm2 = vcmp.gt.f32.partialorder %v3616_v12, 0.0  ;;  %v3680_v17 = vmul.f32 0.01, %v3616_v12  ;;  %v6536_v42 = vmul.f32 %v5089_v43, %v6429_v47  ;;  %v6539_v54 = vmul.f32 %v5089_v43, %v6434_v19 }
 0x34a   : > { %v6542_v58 = vmul.f32 %v5089_v43, %v6439_v29  ;;  %v6545_v31 = vmul.f32 %v5089_v43, %v6389_v0  ;;  %v6548_v6 = vmul.f32 %v5089_v43, %v6393_v22  ;;  %v6551_v53 = vmul.f32 %v5089_v43, %v6395_v13 }
 0x34b   : > { %v3712_v33 = vsel %vm3648_vm2, %v3616_v12, %v3680_v17  ;;  %v6554_v40 = vmul.f32 %v5089_v43, %v6444_v25  ;;  %v6557_v47 = vmul.f32 %v5089_v43, %v6449_v34  ;;  %v6560_v19 = vmul.f32 %v5089_v43, %v6454_v3 }
 0x34c   : > { %3744 = vst [vmem:[%s6513_s8 + $0xe8] sm:$0xff] %v3712_v33  ;;  %v6563_v29 = vmul.f32 %v5089_v43, %v6459_v35  ;;  %v6566_v0 = vmul.f32 %v5089_v43, %v6464_v1  ;;  %v6569_v22 = vmul.f32 %v5089_v43, %v6469_v8  ;;  %v6572_v13 = vmul.f32 %v5089_v43, %v6365_v56 }
 0x34d   : > { %v6575_v25 = vmul.f32 %v5089_v43, %v6367_v45  ;;  %v6578_v34 = vmul.f32 %v5089_v43, %v6369_v44  ;;  %v6581_v3 = vmul.f32 %v5089_v43, %v6371_v27  ;;  %v6584_v35 = vmul.f32 %v5089_v43, %v6373_v9 }
 0x34e   : > { %v6587_v1 = vmul.f32 %v5089_v43, %v6375_v61  ;;  %v6590_v8 = vmul.f32 %v5089_v43, %v6377_v28  ;;  %v6593_v56 = vmul.f32 %v5089_v43, %v6379_v2  ;;  %v6596_v45 = vmul.f32 %v5089_v43, %v6381_v32 }
 0x34f   : > { %v6599_v44 = vmul.f32 %v5089_v43, %v6383_v46  ;;  %v6602_v27 = vmul.f32 %v5089_v43, %v6385_v7  ;;  %v6605_v9 = vmul.f32 %v5089_v43, %v6387_v60  ;;  %vm3619_vm3 = vcmp.gt.f32.partialorder %v3587_v59, 0.0 }
 0x350   : > { %vm3620_vm4 = vcmp.gt.f32.partialorder %v6518_v4, 0.0  ;;  %vm3621_vm5 = vcmp.gt.f32.partialorder %v6521_v63, 0.0  ;;  %vm3622_vm6 = vcmp.gt.f32.partialorder %v6524_v51, 0.0  ;;  %vm3623_vm7 = vcmp.gt.f32.partialorder %v6527_v57, 0.0 }
 0x351   : > { %vm3624_vm8 = vcmp.gt.f32.partialorder %v6530_v11, 0.0  ;;  %vm3625_vm9 = vcmp.gt.f32.partialorder %v6533_v24, 0.0  ;;  %vm3628_vm12 = vcmp.gt.f32.partialorder %v6542_v58, 0.0  ;;  %vm3629_vm13 = vcmp.gt.f32.partialorder %v6554_v40, 0.0 }
 0x352   : > { %v3651_v61 = vmul.f32 0.01, %v3587_v59  ;;  %v3652_v28 = vmul.f32 0.01, %v6518_v4  ;;  %vm3634_vm2 = vcmp.gt.f32.partialorder %v6569_v22, 0.0  ;;  %vm3639_vm14 = vcmp.gt.f32.partialorder %v6584_v35, 0.0 }
 0x353   : > { %v3653_v2 = vmul.f32 0.01, %v6521_v63  ;;  %v3654_v32 = vmul.f32 0.01, %v6524_v51  ;;  %v3655_v46 = vmul.f32 0.01, %v6527_v57 }
 0x354   : > { %vm3640_vm1 = vcmp.gt.f32.partialorder %v6587_v1, 0.0  ;;  %v3656_v7 = vmul.f32 0.01, %v6530_v11  ;;  %v3657_v60 = vmul.f32 0.01, %v6533_v24  ;;  %v3683_v30 = vsel %vm3619_vm3, %v3587_v59, %v3651_v61 }
 0x355   : > { %v3658_v52 = vmul.f32 0.01, %v6536_v42  ;;  %vm3641_vm11 = vcmp.gt.f32.partialorder %v6590_v8, 0.0  ;;  %v3659_v26 = vmul.f32 0.01, %v6539_v54  ;;  %v3684_v48 = vsel %vm3620_vm4, %v6518_v4, %v3652_v28  ;;  %3715 = vst [vmem:[%s6513_s8] sm:$0xff] %v3683_v30 }
 0x356   : > { %v3660_v41 = vmul.f32 0.01, %v6542_v58  ;;  %v3661_v18 = vmul.f32 0.01, %v6554_v40  ;;  %vm3645_vm3 = vcmp.gt.f32.partialorder %v6602_v27, 0.0  ;;  %vm3646_vm10 = vcmp.gt.f32.partialorder %v6605_v9, 0.0 }
 0x357   : > { %vm3647_vm15 = vcmp.gt.f32.partialorder %v6545_v31, 0.0  ;;  %vm3649_vm0 = vcmp.gt.f32.partialorder %v6548_v6, 0.0  ;;  %v3662_v10 = vmul.f32 0.01, %v6557_v47  ;;  %v3663_v55 = vmul.f32 0.01, %v6560_v19 }
 0x358   : > { %v3664_v39 = vmul.f32 0.01, %v6563_v29  ;;  %v3685_v5 = vsel %vm3621_vm5, %v6521_v63, %v3653_v2  ;;  %3716 = vst [vmem:[%s6513_s8 + $0x8] sm:$0xff] %v3684_v48  ;;  %vm3650_vm4 = vcmp.gt.f32.partialorder %v6551_v53, 0.0  ;;  %v3665_v15 = vmul.f32 0.01, %v6566_v0 }
 0x359   : > { %v3666_v37 = vmul.f32 0.01, %v6569_v22  ;;  %v3667_v62 = vmul.f32 0.01, %v6572_v13  ;;  %v3686_v16 = vsel %vm3622_vm6, %v6524_v51, %v3654_v32  ;;  %3717 = vst [vmem:[%s6513_s8 + $0x10] sm:$0xff] %v3685_v5  ;;  %v3687_v36 = vsel %vm3623_vm7, %v6527_v57, %v3655_v46 }
 0x35a   : > { %v3668_v20 = vmul.f32 0.01, %v6575_v25  ;;  %v3669_v38 = vmul.f32 0.01, %v6578_v34  ;;  %v3670_v50 = vmul.f32 0.01, %v6581_v3  ;;  %v3688_v23 = vsel %vm3624_vm8, %v6530_v11, %v3656_v7 }
 0x35b   : > { %3718 = vst [vmem:[%s6513_s8 + $0x18] sm:$0xff] %v3686_v16  ;;  %v3671_v49 = vmul.f32 0.01, %v6584_v35  ;;  %v3672_v14 = vmul.f32 0.01, %v6587_v1  ;;  %3719 = vst [vmem:[%s6513_s8 + $0x20] sm:$0xff] %v3687_v36  ;;  %v3689_v33 = vsel %vm3625_vm9, %v6533_v24, %v3657_v60  ;;  %v3692_v61 = vsel %vm3628_vm12, %v6542_v58, %v3660_v41 }
 0x35c   : > { %v3673_v21 = vmul.f32 0.01, %v6590_v8  ;;  %v3674_v43 = vmul.f32 0.01, %v6593_v56  ;;  %v3675_v12 = vmul.f32 0.01, %v6596_v45 }
 0x35d   : > { %v3676_v17 = vmul.f32 0.01, %v6599_v44  ;;  %3720 = vst [vmem:[%s6513_s8 + $0x28] sm:$0xff] %v3688_v23  ;;  %v3677_v59 = vmul.f32 0.01, %v6602_v27  ;;  %vm6848_vm5 = vcmp.gt.f32.partialorder %v6536_v42, 0.0 }
 0x35e   : > { %v3678_v4 = vmul.f32 0.01, %v6605_v9  ;;  %v3679_v63 = vmul.f32 0.01, %v6545_v31  ;;  %v3690_v51 = vsel %vm6848_vm5, %v6536_v42, %v3658_v52  ;;  %3721 = vst [vmem:[%s6513_s8 + $0x30] sm:$0xff] %v3689_v33  ;;  %vm6849_vm6 = vcmp.gt.f32.partialorder %v6539_v54, 0.0 }
 0x35f   : > { %v3681_v57 = vmul.f32 0.01, %v6548_v6  ;;  %v3682_v11 = vmul.f32 0.01, %v6551_v53  ;;  %v3691_v24 = vsel %vm6849_vm6, %v6539_v54, %v3659_v26  ;;  %3722 = vst [vmem:[%s6513_s8 + $0x38] sm:$0xff] %v3690_v51  ;;  %v3693_v42 = vsel %vm3629_vm13, %v6554_v40, %v3661_v18  ;;  %3724 = vst [vmem:[%s6513_s8 + $0x48] sm:$0xff] %v3692_v61 }
 0x360   : > { %vm6850_vm7 = vcmp.gt.f32.partialorder %v6557_v47, 0.0  ;;  %vm6851_vm8 = vcmp.gt.f32.partialorder %v6560_v19, 0.0  ;;  %vm6852_vm9 = vcmp.gt.f32.partialorder %v6563_v29, 0.0  ;;  %3723 = vst [vmem:[%s6513_s8 + $0x40] sm:$0xff] %v3691_v24  ;;  %vm6853_vm12 = vcmp.gt.f32.partialorder %v6566_v0, 0.0  ;;  %3725 = vst [vmem:[%s6513_s8 + $0x50] sm:$0xff] %v3693_v42 }
 0x361   : > { %v3694_v28 = vsel %vm6850_vm7, %v6557_v47, %v3662_v10  ;;  %v3695_v54 = vsel %vm6851_vm8, %v6560_v19, %v3663_v55  ;;  %v3696_v2 = vsel %vm6852_vm9, %v6563_v29, %v3664_v39  ;;  %v3697_v58 = vsel %vm6853_vm12, %v6566_v0, %v3665_v15 }
 0x362   : > { %v3698_v40 = vsel %vm3634_vm2, %v6569_v22, %v3666_v37  ;;  %vm6854_vm13 = vcmp.gt.f32.partialorder %v6572_v13, 0.0  ;;  %vm6855_vm5 = vcmp.gt.f32.partialorder %v6575_v25, 0.0  ;;  %3726 = vst [vmem:[%s6513_s8 + $0x58] sm:$0xff] %v3694_v28  ;;  %3727 = vst [vmem:[%s6513_s8 + $0x60] sm:$0xff] %v3695_v54  ;;  %vm6856_vm6 = vcmp.gt.f32.partialorder %v6578_v34, 0.0 }
 0x363   : > { %v3699_v47 = vsel %vm6854_vm13, %v6572_v13, %v3667_v62  ;;  %v3700_v19 = vsel %vm6855_vm5, %v6575_v25, %v3668_v20  ;;  %3728 = vst [vmem:[%s6513_s8 + $0x68] sm:$0xff] %v3696_v2  ;;  %v3701_v29 = vsel %vm6856_vm6, %v6578_v34, %v3669_v38  ;;  %vm6857_vm2 = vcmp.gt.f32.partialorder %v6581_v3, 0.0  ;;  %3729 = vst [vmem:[%s6513_s8 + $0x70] sm:$0xff] %v3697_v58 }
 0x364   : > { %v3702_v0 = vsel %vm6857_vm2, %v6581_v3, %v3670_v50  ;;  %v3703_v22 = vsel %vm3639_vm14, %v6584_v35, %v3671_v49  ;;  %v3704_v13 = vsel %vm3640_vm1, %v6587_v1, %v3672_v14  ;;  %3730 = vst [vmem:[%s6513_s8 + $0x78] sm:$0xff] %v3698_v40  ;;  %3731 = vst [vmem:[%s6513_s8 + $0x80] sm:$0xff] %v3699_v47  ;;  %vm6858_vm7 = vcmp.gt.f32.partialorder %v6593_v56, 0.0 }
 0x365   : > { %3732 = vst [vmem:[%s6513_s8 + $0x88] sm:$0xff] %v3700_v19  ;;  %v3705_v25 = vsel %vm3641_vm11, %v6590_v8, %v3673_v21  ;;  %v3706_v34 = vsel %vm6858_vm7, %v6593_v56, %v3674_v43  ;;  %vm6859_vm14 = vcmp.gt.f32.partialorder %v6596_v45, 0.0  ;;  %vm6860_vm1 = vcmp.gt.f32.partialorder %v6599_v44, 0.0  ;;  %3733 = vst [vmem:[%s6513_s8 + $0x90] sm:$0xff] %v3701_v29 }
 0x366   : > { %v3707_v3 = vsel %vm6859_vm14, %v6596_v45, %v3675_v12  ;;  %v3708_v35 = vsel %vm6860_vm1, %v6599_v44, %v3676_v17  ;;  %3734 = vst [vmem:[%s6513_s8 + $0x98] sm:$0xff] %v3702_v0  ;;  %3735 = vst [vmem:[%s6513_s8 + $0xa0] sm:$0xff] %v3703_v22  ;;  %v3709_v1 = vsel %vm3645_vm3, %v6602_v27, %v3677_v59 }
 0x367   : > { %3736 = vst [vmem:[%s6513_s8 + $0xa8] sm:$0xff] %v3704_v13  ;;  %v3710_v8 = vsel %vm3646_vm10, %v6605_v9, %v3678_v4  ;;  %v3711_v56 = vsel %vm3647_vm15, %v6545_v31, %v3679_v63  ;;  %v3713_v45 = vsel %vm3649_vm0, %v6548_v6, %v3681_v57  ;;  %3737 = vst [vmem:[%s6513_s8 + $0xb0] sm:$0xff] %v3705_v25 }
 0x368   : > { %3738 = vst [vmem:[%s6513_s8 + $0xb8] sm:$0xff] %v3706_v34  ;;  %3739 = vst [vmem:[%s6513_s8 + $0xc0] sm:$0xff] %v3707_v3  ;;  %v3714_v44 = vsel %vm3650_vm4, %v6551_v53, %v3682_v11 }
 0x369   : > { %3740 = vst [vmem:[%s6513_s8 + $0xc8] sm:$0xff] %v3708_v35  ;;  %3741 = vst [vmem:[%s6513_s8 + $0xd0] sm:$0xff] %v3709_v1 }
 0x36a   : > { %3742 = vst [vmem:[%s6513_s8 + $0xd8] sm:$0xff] %v3710_v8  ;;  %3743 = vst [vmem:[%s6513_s8 + $0xe0] sm:$0xff] %v3711_v56 }
 0x36b   : > { %3745 = vst [vmem:[%s6513_s8 + $0xf0] sm:$0xff] %v3713_v45  ;;  %3746 = vst [vmem:[%s6513_s8 + $0xf8] sm:$0xff] %v3714_v44 }
 0x36c   : > { %5112 = shalt.err (!%p5109_p3)
}
 0x36d   : > { %s5113_s22 = scalar_lea.hbm %s6770_s13, 4096  ;;  %s5117_s30 = scalar_lea.hbm %s6845_s4, 8192 }
 0x36e   : > { %p5114_p4 = scmp.ne.s32.totalorder %s6770_s13, %s5113_s22  ;;  %p5118_p9 = scmp.lt.u32.totalorder %s6770_s13, %s6845_s4 }
 0x36f   : > { %p5119_p10 = scmp.lt.u32.totalorder %s5117_s30, %s5113_s22  ;;  %p5121_p12 = scmp.lt.u32.totalorder %s5113_s22, %s6770_s13 }
 0x370   : > { %p5115_p7 = pnand %p5114_p4, %p5231_p5 }
 0x371   : > { %p5120_p11 = por %p5119_p10, %p5118_p9 }
 0x372   : > { %p5116_p8 = pneg %p5115_p7 }
 0x373   : > { %p5122_p13 = por %p5121_p12, %p5120_p11 }
 0x375   : > { %p5123_p0 = pnand %p5122_p13, %p5116_p8 }
 0x377   : > { %5126 = shalt.err (!%p5123_p0)
}
 0x378   : > { %s5166_s7 = smov 128   ;;  %s5167_s8 = smov 8  }
 0x379   : > { %4973 = dma.vmem_to_hbm [thread:$0]  (%p5231_p5), %s6772_s10, 4096, %s6770_s13, %s6800_s14, %s5166_s7, %s5166_s7, %s5167_s8  }
 0x37a PF: > { %p4979_p1 = scmp.ge.s32.totalorder %s5161_s18, 2  ;;  %s3776_s9 = sand.u32 1, %s5149_s15  }
 0x37b   : > { %s3777_s19 = scalar_lea.sflag [#allocation4], %s3776_s9 }
 0x37c   : > { %p4976_p2 = pnand %p4979_p1, %p5235_p6 }
 0x37e   : > { %5144 = dma.done.wait (!%p4976_p2), %s3777_s19, 4096  }
 0x37f   : > { %5146 = vsyncadd (!%p4976_p2), %s3777_s19, 4294963200  ;;  %p14_p3 = scmp.ge.s32.totalorder %s5218_s21, 4   ;;  %s6861_s15 = smov %s5153_s16 }
 0x380   : > { %s6862_s16 = smov %s5157_s17  ;;  %s6863_s17 = smov %s5229_s24 }
 0x381   : > { %s6864_s18 = smov %s5218_s21  ;;  %16 = sbr.rel (!%p14_p3) target bundleno = 3 (0x3), region = 83 }
 0x388   :  { %3782 = vsyncpa [#allocation4], 1 }
 0x389   :  { %3784 = vsyncpa [#allocation4 + $0x1], 1 }

</bundles_post_ra>
